<compile_context>
chip_gen: v6e
topology: v6e:2x2x1
jax: 0.10.0
libtpu: 0.0.40
codegen_flags: <defaults>
</compile_context>

<pallas_src>
import functools

import jax
import jax.numpy as jnp
from jax.experimental import pallas as pl
from jax.experimental.pallas import tpu as pltpu

BN_EPS = 1e-5
HEAD_PAD = 128  # pad head output lanes to 128 for an unmasked, lane-dense store


def _bn_relu_fused(h, gamma, beta):
    """Training-mode BatchNorm1d + ReLU, folded into one scale/shift.

    h: [B, D] float32, gamma/beta: [1, D] float32.
    One-sweep stats: var = E[h^2] - mu^2 (biased, matching PyTorch training BN).
    """
    n = h.shape[0]
    inv_n = jnp.float32(1.0 / n)
    s1 = jnp.sum(h, axis=0, keepdims=True)
    s2 = jnp.sum(h * h, axis=0, keepdims=True)
    mu = s1 * inv_n
    var = s2 * inv_n - mu * mu
    inv = jax.lax.rsqrt(var + BN_EPS)          # EUP, per-column row only
    scale = gamma * inv                        # [1, D]
    shift = beta - mu * scale                  # [1, D]
    return jnp.maximum(h * scale + shift, 0.0)


def ffnn_kernel(x_ref,
                w1_ref, g1_ref, be1_ref,
                w2_ref, g2_ref, be2_ref,
                w3_ref, g3_ref, be3_ref,
                w4_ref, g4_ref, be4_ref,
                wh_ref, bh_ref,
                o_ref):
    # Activations cast to bf16 at every MXU input; accumulate in f32.
    x = x_ref[...].astype(jnp.bfloat16)

    # layer 1: Linear(in, 1024) [bias dropped: cancelled by BN] -> BN -> ReLU
    h = jnp.dot(x, w1_ref[...], preferred_element_type=jnp.float32)
    h = _bn_relu_fused(h, g1_ref[...], be1_ref[...])

    # layer 2: Linear(1024, 512) -> BN -> ReLU
    h = jnp.dot(h.astype(jnp.bfloat16), w2_ref[...],
                preferred_element_type=jnp.float32)
    h = _bn_relu_fused(h, g2_ref[...], be2_ref[...])

    # layer 3: Linear(512, 256) -> BN -> ReLU
    h = jnp.dot(h.astype(jnp.bfloat16), w3_ref[...],
                preferred_element_type=jnp.float32)
    h = _bn_relu_fused(h, g3_ref[...], be3_ref[...])

    # layer 4: Linear(256, 128) -> BN -> ReLU
    h = jnp.dot(h.astype(jnp.bfloat16), w4_ref[...],
                preferred_element_type=jnp.float32)
    h = _bn_relu_fused(h, g4_ref[...], be4_ref[...])

    # head: Linear(128, HEAD_PAD) -> sigmoid, lane-dense [B, 128] store.
    logits = jnp.dot(h.astype(jnp.bfloat16), wh_ref[...],
                     preferred_element_type=jnp.float32) + bh_ref[...]
    o_ref[...] = jax.nn.sigmoid(logits)


@functools.partial(jax.jit, static_argnames=("output_size",))
def ffnn_forward(x, params, output_size):
    """x: [B, input_size] float32; params: flat tuple from init_params."""
    batch = x.shape[0]
    n_inputs = 1 + len(params)
    vmem_spec = pl.BlockSpec(memory_space=pltpu.MemorySpace.VMEM)
    out_padded = pl.pallas_call(
        ffnn_kernel,
        out_shape=jax.ShapeDtypeStruct((batch, HEAD_PAD), jnp.float32),
        in_specs=[vmem_spec] * n_inputs,
        out_specs=vmem_spec,
        compiler_params=pltpu.CompilerParams(
            vmem_limit_bytes=32 * 1024 * 1024),
    )(x, *params)
    # Slice the lane-dense slab down to the real head width.
    return out_padded[:, :output_size]


def init_params(key, input_size, output_size):
    """Parameter init mirroring the PyTorch module.

    Linear weights are stored transposed ([in, out]) and in bfloat16 (f32
    accumulation in the kernel).  Layers 1-4 carry no Linear bias: under
    training-mode BN the bias is mathematically cancelled, so it is omitted.
    BN gamma/beta and the head bias stay f32, shaped [1, out].  The head
    weight/bias are zero-padded to HEAD_PAD output lanes.
    """
    dims = [(input_size, 1024), (1024, 512), (512, 256), (256, 128)]
    params = []
    for (din, dout) in dims:
        key, kw = jax.random.split(key)
        bound = 1.0 / jnp.sqrt(jnp.float32(din))
        w = jax.random.uniform(kw, (din, dout), jnp.float32, -bound, bound)
        params.append(w.astype(jnp.bfloat16))
        params.append(jnp.ones((1, dout), jnp.float32))    # BN gamma
        params.append(jnp.zeros((1, dout), jnp.float32))   # BN beta
    # head: Linear(128, output_size), padded to HEAD_PAD lanes
    key, kw, kb = jax.random.split(key, 3)
    bound = 1.0 / jnp.sqrt(jnp.float32(128))
    wh = jax.random.uniform(kw, (128, output_size), jnp.float32, -bound, bound)
    bh = jax.random.uniform(kb, (1, output_size), jnp.float32, -bound, bound)
    wh_pad = jnp.zeros((128, HEAD_PAD), jnp.float32).at[:, :output_size].set(wh)
    bh_pad = jnp.zeros((1, HEAD_PAD), jnp.float32).at[:, :output_size].set(bh)
    params.append(wh_pad.astype(jnp.bfloat16))
    params.append(bh_pad)
    return tuple(params)


def reference_forward(x, params, output_size):
    """Pure-JAX reference with the same numerics (bf16 matmul operands,
    f32 accumulation, two-pass training-mode BN) for a sanity check."""
    (w1, g1, be1, w2, g2, be2, w3, g3, be3, w4, g4, be4, wh, bh) = params

    def lin(h, w):
        return jnp.dot(h.astype(jnp.bfloat16), w,
                       preferred_element_type=jnp.float32)

    def bn_relu(h, g, be):
        mu = jnp.mean(h, axis=0, keepdims=True)
        var = jnp.mean((h - mu) ** 2, axis=0, keepdims=True)
        return jnp.maximum((h - mu) / jnp.sqrt(var + BN_EPS) * g + be, 0.0)

    h = bn_relu(lin(x, w1), g1, be1)
    h = bn_relu(lin(h, w2), g2, be2)
    h = bn_relu(lin(h, w3), g3, be3)
    h = bn_relu(lin(h, w4), g4, be4)
    out = jax.nn.sigmoid(lin(h, wh) + bh)
    return out[:, :output_size]


if __name__ == "__main__":
    key = jax.random.PRNGKey(0)
    batch, input_size, output_size = 16, 64, 8

    kx, kp = jax.random.split(key)
    x = jax.random.normal(kx, (batch, input_size), jnp.float32)
    params = init_params(kp, input_size, output_size)

    out = ffnn_forward(x, params, output_size)
    out = jax.block_until_ready(out)

    ref = reference_forward(x, params, output_size)
    assert out.shape == (batch, output_size)
    # bf16 matmul operands + one-pass vs two-pass BN stats -> slightly looser
    # tolerance than pure-f32.
    assert jnp.allclose(out, ref, atol=1e-3, rtol=1e-3), "mismatch vs reference"

    print("KERNEL_OK")
</pallas_src>

<mosaic_0001>
module attributes {stable_mosaic.version = 11 : i64} {
  func.func @ffnn_kernel(%arg0: memref<16x64xf32, #tpu.memory_space<vmem>>, %arg1: memref<64x1024xbf16, #tpu.memory_space<vmem>>, %arg2: memref<1x1024xf32, #tpu.memory_space<vmem>>, %arg3: memref<1x1024xf32, #tpu.memory_space<vmem>>, %arg4: memref<1024x512xbf16, #tpu.memory_space<vmem>>, %arg5: memref<1x512xf32, #tpu.memory_space<vmem>>, %arg6: memref<1x512xf32, #tpu.memory_space<vmem>>, %arg7: memref<512x256xbf16, #tpu.memory_space<vmem>>, %arg8: memref<1x256xf32, #tpu.memory_space<vmem>>, %arg9: memref<1x256xf32, #tpu.memory_space<vmem>>, %arg10: memref<256x128xbf16, #tpu.memory_space<vmem>>, %arg11: memref<1x128xf32, #tpu.memory_space<vmem>>, %arg12: memref<1x128xf32, #tpu.memory_space<vmem>>, %arg13: memref<128x128xbf16, #tpu.memory_space<vmem>>, %arg14: memref<1x128xf32, #tpu.memory_space<vmem>>, %arg15: memref<16x128xf32, #tpu.memory_space<vmem>>) attributes {dimension_semantics = [], scalar_prefetch = 0 : i64, scratch_operands = 0 : i64, tpu.core_type = #tpu.core_type<tc>} {
    %c0 = arith.constant 0 : index
    %c0_0 = arith.constant 0 : index
    %0 = vector.load %arg0[%c0, %c0_0] : memref<16x64xf32, #tpu.memory_space<vmem>>, vector<16x64xf32>
    %1 = arith.truncf %0 : vector<16x64xf32> to vector<16x64xbf16>
    %c0_1 = arith.constant 0 : index
    %c0_2 = arith.constant 0 : index
    %2 = vector.load %arg1[%c0_1, %c0_2] : memref<64x1024xbf16, #tpu.memory_space<vmem>>, vector<64x1024xbf16>
    %cst = arith.constant dense<0.000000e+00> : vector<16x1024xf32>
    %3 = tpu.matmul %1, %2, %cst {dimension_numbers = #tpu.dot_dimension_numbers<[1], [0], [0], [1], [0, 0, 1, 1], [], []>} : vector<16x64xbf16>, vector<64x1024xbf16>, vector<16x1024xf32> -> vector<16x1024xf32>
    %c0_3 = arith.constant 0 : index
    %c0_4 = arith.constant 0 : index
    %4 = vector.load %arg2[%c0_3, %c0_4] : memref<1x1024xf32, #tpu.memory_space<vmem>>, vector<1x1024xf32>
    %c0_5 = arith.constant 0 : index
    %c0_6 = arith.constant 0 : index
    %5 = vector.load %arg3[%c0_5, %c0_6] : memref<1x1024xf32, #tpu.memory_space<vmem>>, vector<1x1024xf32>
    %cst_7 = arith.constant dense<0.000000e+00> : vector<1024xf32>
    %6 = vector.multi_reduction <add>, %3, %cst_7 [0] : vector<16x1024xf32> to vector<1024xf32>
    %7 = vector.shape_cast %6 : vector<1024xf32> to vector<1x1024xf32>
    %8 = arith.mulf %3, %3 : vector<16x1024xf32>
    %cst_8 = arith.constant dense<0.000000e+00> : vector<1024xf32>
    %9 = vector.multi_reduction <add>, %8, %cst_8 [0] : vector<16x1024xf32> to vector<1024xf32>
    %10 = vector.shape_cast %9 : vector<1024xf32> to vector<1x1024xf32>
    %cst_9 = arith.constant 6.250000e-02 : f32
    %11 = vector.broadcast %cst_9 : f32 to vector<1x1024xf32>
    %12 = arith.mulf %7, %11 : vector<1x1024xf32>
    %cst_10 = arith.constant 6.250000e-02 : f32
    %13 = vector.broadcast %cst_10 : f32 to vector<1x1024xf32>
    %14 = arith.mulf %10, %13 : vector<1x1024xf32>
    %15 = arith.mulf %12, %12 : vector<1x1024xf32>
    %16 = arith.subf %14, %15 : vector<1x1024xf32>
    %cst_11 = arith.constant 9.99999974E-6 : f32
    %17 = vector.broadcast %cst_11 : f32 to vector<1x1024xf32>
    %18 = arith.addf %16, %17 : vector<1x1024xf32>
    %19 = math.rsqrt %18 : vector<1x1024xf32>
    %20 = arith.mulf %4, %19 : vector<1x1024xf32>
    %21 = arith.mulf %12, %20 : vector<1x1024xf32>
    %22 = arith.subf %5, %21 : vector<1x1024xf32>
    %23 = vector.broadcast %20 : vector<1x1024xf32> to vector<16x1024xf32>
    %24 = arith.mulf %3, %23 : vector<16x1024xf32>
    %25 = vector.broadcast %22 : vector<1x1024xf32> to vector<16x1024xf32>
    %26 = arith.addf %24, %25 : vector<16x1024xf32>
    %cst_12 = arith.constant 0.000000e+00 : f32
    %27 = vector.broadcast %cst_12 : f32 to vector<16x1024xf32>
    %28 = arith.maximumf %26, %27 : vector<16x1024xf32>
    %29 = arith.truncf %28 : vector<16x1024xf32> to vector<16x1024xbf16>
    %c0_13 = arith.constant 0 : index
    %c0_14 = arith.constant 0 : index
    %30 = vector.load %arg4[%c0_13, %c0_14] : memref<1024x512xbf16, #tpu.memory_space<vmem>>, vector<1024x512xbf16>
    %cst_15 = arith.constant dense<0.000000e+00> : vector<16x512xf32>
    %31 = tpu.matmul %29, %30, %cst_15 {dimension_numbers = #tpu.dot_dimension_numbers<[1], [0], [0], [1], [0, 0, 1, 1], [], []>} : vector<16x1024xbf16>, vector<1024x512xbf16>, vector<16x512xf32> -> vector<16x512xf32>
    %c0_16 = arith.constant 0 : index
    %c0_17 = arith.constant 0 : index
    %32 = vector.load %arg5[%c0_16, %c0_17] : memref<1x512xf32, #tpu.memory_space<vmem>>, vector<1x512xf32>
    %c0_18 = arith.constant 0 : index
    %c0_19 = arith.constant 0 : index
    %33 = vector.load %arg6[%c0_18, %c0_19] : memref<1x512xf32, #tpu.memory_space<vmem>>, vector<1x512xf32>
    %cst_20 = arith.constant dense<0.000000e+00> : vector<512xf32>
    %34 = vector.multi_reduction <add>, %31, %cst_20 [0] : vector<16x512xf32> to vector<512xf32>
    %35 = vector.shape_cast %34 : vector<512xf32> to vector<1x512xf32>
    %36 = arith.mulf %31, %31 : vector<16x512xf32>
    %cst_21 = arith.constant dense<0.000000e+00> : vector<512xf32>
    %37 = vector.multi_reduction <add>, %36, %cst_21 [0] : vector<16x512xf32> to vector<512xf32>
    %38 = vector.shape_cast %37 : vector<512xf32> to vector<1x512xf32>
    %cst_22 = arith.constant 6.250000e-02 : f32
    %39 = vector.broadcast %cst_22 : f32 to vector<1x512xf32>
    %40 = arith.mulf %35, %39 : vector<1x512xf32>
    %cst_23 = arith.constant 6.250000e-02 : f32
    %41 = vector.broadcast %cst_23 : f32 to vector<1x512xf32>
    %42 = arith.mulf %38, %41 : vector<1x512xf32>
    %43 = arith.mulf %40, %40 : vector<1x512xf32>
    %44 = arith.subf %42, %43 : vector<1x512xf32>
    %cst_24 = arith.constant 9.99999974E-6 : f32
    %45 = vector.broadcast %cst_24 : f32 to vector<1x512xf32>
    %46 = arith.addf %44, %45 : vector<1x512xf32>
    %47 = math.rsqrt %46 : vector<1x512xf32>
    %48 = arith.mulf %32, %47 : vector<1x512xf32>
    %49 = arith.mulf %40, %48 : vector<1x512xf32>
    %50 = arith.subf %33, %49 : vector<1x512xf32>
    %51 = vector.broadcast %48 : vector<1x512xf32> to vector<16x512xf32>
    %52 = arith.mulf %31, %51 : vector<16x512xf32>
    %53 = vector.broadcast %50 : vector<1x512xf32> to vector<16x512xf32>
    %54 = arith.addf %52, %53 : vector<16x512xf32>
    %cst_25 = arith.constant 0.000000e+00 : f32
    %55 = vector.broadcast %cst_25 : f32 to vector<16x512xf32>
    %56 = arith.maximumf %54, %55 : vector<16x512xf32>
    %57 = arith.truncf %56 : vector<16x512xf32> to vector<16x512xbf16>
    %c0_26 = arith.constant 0 : index
    %c0_27 = arith.constant 0 : index
    %58 = vector.load %arg7[%c0_26, %c0_27] : memref<512x256xbf16, #tpu.memory_space<vmem>>, vector<512x256xbf16>
    %cst_28 = arith.constant dense<0.000000e+00> : vector<16x256xf32>
    %59 = tpu.matmul %57, %58, %cst_28 {dimension_numbers = #tpu.dot_dimension_numbers<[1], [0], [0], [1], [0, 0, 1, 1], [], []>} : vector<16x512xbf16>, vector<512x256xbf16>, vector<16x256xf32> -> vector<16x256xf32>
    %c0_29 = arith.constant 0 : index
    %c0_30 = arith.constant 0 : index
    %60 = vector.load %arg8[%c0_29, %c0_30] : memref<1x256xf32, #tpu.memory_space<vmem>>, vector<1x256xf32>
    %c0_31 = arith.constant 0 : index
    %c0_32 = arith.constant 0 : index
    %61 = vector.load %arg9[%c0_31, %c0_32] : memref<1x256xf32, #tpu.memory_space<vmem>>, vector<1x256xf32>
    %cst_33 = arith.constant dense<0.000000e+00> : vector<256xf32>
    %62 = vector.multi_reduction <add>, %59, %cst_33 [0] : vector<16x256xf32> to vector<256xf32>
    %63 = vector.shape_cast %62 : vector<256xf32> to vector<1x256xf32>
    %64 = arith.mulf %59, %59 : vector<16x256xf32>
    %cst_34 = arith.constant dense<0.000000e+00> : vector<256xf32>
    %65 = vector.multi_reduction <add>, %64, %cst_34 [0] : vector<16x256xf32> to vector<256xf32>
    %66 = vector.shape_cast %65 : vector<256xf32> to vector<1x256xf32>
    %cst_35 = arith.constant 6.250000e-02 : f32
    %67 = vector.broadcast %cst_35 : f32 to vector<1x256xf32>
    %68 = arith.mulf %63, %67 : vector<1x256xf32>
    %cst_36 = arith.constant 6.250000e-02 : f32
    %69 = vector.broadcast %cst_36 : f32 to vector<1x256xf32>
    %70 = arith.mulf %66, %69 : vector<1x256xf32>
    %71 = arith.mulf %68, %68 : vector<1x256xf32>
    %72 = arith.subf %70, %71 : vector<1x256xf32>
    %cst_37 = arith.constant 9.99999974E-6 : f32
    %73 = vector.broadcast %cst_37 : f32 to vector<1x256xf32>
    %74 = arith.addf %72, %73 : vector<1x256xf32>
    %75 = math.rsqrt %74 : vector<1x256xf32>
    %76 = arith.mulf %60, %75 : vector<1x256xf32>
    %77 = arith.mulf %68, %76 : vector<1x256xf32>
    %78 = arith.subf %61, %77 : vector<1x256xf32>
    %79 = vector.broadcast %76 : vector<1x256xf32> to vector<16x256xf32>
    %80 = arith.mulf %59, %79 : vector<16x256xf32>
    %81 = vector.broadcast %78 : vector<1x256xf32> to vector<16x256xf32>
    %82 = arith.addf %80, %81 : vector<16x256xf32>
    %cst_38 = arith.constant 0.000000e+00 : f32
    %83 = vector.broadcast %cst_38 : f32 to vector<16x256xf32>
    %84 = arith.maximumf %82, %83 : vector<16x256xf32>
    %85 = arith.truncf %84 : vector<16x256xf32> to vector<16x256xbf16>
    %c0_39 = arith.constant 0 : index
    %c0_40 = arith.constant 0 : index
    %86 = vector.load %arg10[%c0_39, %c0_40] : memref<256x128xbf16, #tpu.memory_space<vmem>>, vector<256x128xbf16>
    %cst_41 = arith.constant dense<0.000000e+00> : vector<16x128xf32>
    %87 = tpu.matmul %85, %86, %cst_41 {dimension_numbers = #tpu.dot_dimension_numbers<[1], [0], [0], [1], [0, 0, 1, 1], [], []>} : vector<16x256xbf16>, vector<256x128xbf16>, vector<16x128xf32> -> vector<16x128xf32>
    %c0_42 = arith.constant 0 : index
    %c0_43 = arith.constant 0 : index
    %88 = vector.load %arg11[%c0_42, %c0_43] : memref<1x128xf32, #tpu.memory_space<vmem>>, vector<1x128xf32>
    %c0_44 = arith.constant 0 : index
    %c0_45 = arith.constant 0 : index
    %89 = vector.load %arg12[%c0_44, %c0_45] : memref<1x128xf32, #tpu.memory_space<vmem>>, vector<1x128xf32>
    %cst_46 = arith.constant dense<0.000000e+00> : vector<128xf32>
    %90 = vector.multi_reduction <add>, %87, %cst_46 [0] : vector<16x128xf32> to vector<128xf32>
    %91 = vector.shape_cast %90 : vector<128xf32> to vector<1x128xf32>
    %92 = arith.mulf %87, %87 : vector<16x128xf32>
    %cst_47 = arith.constant dense<0.000000e+00> : vector<128xf32>
    %93 = vector.multi_reduction <add>, %92, %cst_47 [0] : vector<16x128xf32> to vector<128xf32>
    %94 = vector.shape_cast %93 : vector<128xf32> to vector<1x128xf32>
    %cst_48 = arith.constant 6.250000e-02 : f32
    %95 = vector.broadcast %cst_48 : f32 to vector<1x128xf32>
    %96 = arith.mulf %91, %95 : vector<1x128xf32>
    %cst_49 = arith.constant 6.250000e-02 : f32
    %97 = vector.broadcast %cst_49 : f32 to vector<1x128xf32>
    %98 = arith.mulf %94, %97 : vector<1x128xf32>
    %99 = arith.mulf %96, %96 : vector<1x128xf32>
    %100 = arith.subf %98, %99 : vector<1x128xf32>
    %cst_50 = arith.constant 9.99999974E-6 : f32
    %101 = vector.broadcast %cst_50 : f32 to vector<1x128xf32>
    %102 = arith.addf %100, %101 : vector<1x128xf32>
    %103 = math.rsqrt %102 : vector<1x128xf32>
    %104 = arith.mulf %88, %103 : vector<1x128xf32>
    %105 = arith.mulf %96, %104 : vector<1x128xf32>
    %106 = arith.subf %89, %105 : vector<1x128xf32>
    %107 = vector.broadcast %104 : vector<1x128xf32> to vector<16x128xf32>
    %108 = arith.mulf %87, %107 : vector<16x128xf32>
    %109 = vector.broadcast %106 : vector<1x128xf32> to vector<16x128xf32>
    %110 = arith.addf %108, %109 : vector<16x128xf32>
    %cst_51 = arith.constant 0.000000e+00 : f32
    %111 = vector.broadcast %cst_51 : f32 to vector<16x128xf32>
    %112 = arith.maximumf %110, %111 : vector<16x128xf32>
    %113 = arith.truncf %112 : vector<16x128xf32> to vector<16x128xbf16>
    %c0_52 = arith.constant 0 : index
    %c0_53 = arith.constant 0 : index
    %114 = vector.load %arg13[%c0_52, %c0_53] : memref<128x128xbf16, #tpu.memory_space<vmem>>, vector<128x128xbf16>
    %cst_54 = arith.constant dense<0.000000e+00> : vector<16x128xf32>
    %115 = tpu.matmul %113, %114, %cst_54 {dimension_numbers = #tpu.dot_dimension_numbers<[1], [0], [0], [1], [0, 0, 1, 1], [], []>} : vector<16x128xbf16>, vector<128x128xbf16>, vector<16x128xf32> -> vector<16x128xf32>
    %c0_55 = arith.constant 0 : index
    %c0_56 = arith.constant 0 : index
    %116 = vector.load %arg14[%c0_55, %c0_56] : memref<1x128xf32, #tpu.memory_space<vmem>>, vector<1x128xf32>
    %117 = vector.broadcast %116 : vector<1x128xf32> to vector<16x128xf32>
    %118 = arith.addf %115, %117 : vector<16x128xf32>
    %119 = arith.negf %118 : vector<16x128xf32>
    %120 = math.exp %119 : vector<16x128xf32>
    %cst_57 = arith.constant 1.000000e+00 : f32
    %121 = vector.broadcast %cst_57 : f32 to vector<16x128xf32>
    %122 = arith.addf %121, %120 : vector<16x128xf32>
    %123 = arith.divf %121, %122 : vector<16x128xf32>
    %c0_58 = arith.constant 0 : index
    %c0_59 = arith.constant 0 : index
    %124 = vector.load %arg15[%c0_58, %c0_59] : memref<16x128xf32, #tpu.memory_space<vmem>>, vector<16x128xf32>
    tpu.vector_store %arg15[%c0_58, %c0_59], %123 {strides = array<i32>} : memref<16x128xf32, #tpu.memory_space<vmem>>, vector<16x128xf32>,
    return
  }
}

</mosaic_0001>

<bundles_post_ra>
// kernel: ffnn_forward.1
= control target key start
LH: loop header
LB: loop body
LE: loop exit
PB: predicated region body
PF: predicated region fallthrough
CT: control target
= control target key end

     0   :  { %20 = vsyncpa [#allocation3], 0  ;;  %s5668_s0 = inlined_call_operand.hbm [shape: f32[16,64], index: 0, kind: input, shape index: {}]   ;;  %s5669_s1 = inlined_call_operand.hbm [shape: bf16[64,1024], index: 1, kind: input, shape index: {}]   ;;  %s5670_s2 = inlined_call_operand.hbm [shape: f32[1,1024], index: 2, kind: input, shape index: {}]   ;;  %s5671_s3 = inlined_call_operand.hbm [shape: f32[1,1024], index: 3, kind: input, shape index: {}]   ;;  %s5672_s4 = inlined_call_operand.hbm [shape: bf16[1024,512], index: 4, kind: input, shape index: {}]   ;;  %s5673_s5 = inlined_call_operand.vmem [shape: f32[1,512], index: 5, kind: input, shape index: {}]   ;;  %s5674_s6 = inlined_call_operand.vmem [shape: f32[1,512], index: 6, kind: input, shape index: {}]   ;;  %s5675_s7 = inlined_call_operand.hbm [shape: bf16[512,256], index: 7, kind: input, shape index: {}]   ;;  %s5676_s8 = inlined_call_operand.vmem [shape: f32[1,256], index: 8, kind: input, shape index: {}]   ;;  %s5677_s9 = inlined_call_operand.vmem [shape: f32[1,256], index: 9, kind: input, shape index: {}]   ;;  %s5678_s10 = inlined_call_operand.hbm [shape: bf16[256,128], index: 10, kind: input, shape index: {}]   ;;  %s5679_s11 = inlined_call_operand.vmem [shape: f32[1,128], index: 11, kind: input, shape index: {}]   ;;  %s5680_s12 = inlined_call_operand.vmem [shape: f32[1,128], index: 12, kind: input, shape index: {}]   ;;  %s5681_s13 = inlined_call_operand.hbm [shape: bf16[128,128], index: 13, kind: input, shape index: {}]   ;;  %s5682_s14 = inlined_call_operand.vmem [shape: f32[1,128], index: 14, kind: input, shape index: {}]   ;;  %s5683_s15 = inlined_call_operand.vmem [shape: f32[16,128], index: 15, kind: output, shape index: {}]  }
   0x1   :  { %21 = vsyncpa [#allocation5], 0 }
   0x2   :  { %22 = vsyncpa [#allocation8], 0 }
   0x3   :  { %23 = vsyncpa [#allocation11], 0 }
   0x4   :  { %24 = vsyncpa [#allocation14], 0  ;;  %s5181_s18 = smov [#allocation4]  }
   0x5   :  { %s42_s19 = sshll.u32 %s5181_s18, 4  ;;  %s43_s19 = int_to_ptr.vmem [resolvable:$true] %s42_s19 }
   0x6   :  { %s5019_s20 = scalar_lea.vmem %s43_s19, 4096  ;;  %p5024_p1 = scmp.lt.s32.totalorder %s43_s19, %s43_s19 }
   0x7   :  { %p5020_p0 = scmp.ne.s32.totalorder %s43_s19, %s5019_s20  ;;  %p5025_p2 = scmp.lt.s32.totalorder %s5019_s20, %s5019_s20 }
   0x9   :  { %p5026_p3 = por %p5025_p2, %p5024_p1 }
   0xb   :  { %p5027_p4 = pnand %p5026_p3, %p5020_p0 }
   0xd   :  { %5030 = shalt.err (!%p5027_p4)
}
   0xe   :  { %s5182_s21 = smov 512   ;;  %s5183_s22 = smov 32  }
   0xf   :  { %48 = dma.hbm_to_vmem [thread:$0]  %s5669_s1, 4096, %s43_s19, [#allocation5], %s5182_s21, %s5182_s21, %s5183_s22  }
  0x10   :  { %s5184_s25 = smov [#allocation7]  }
  0x11   :  { %s65_s26 = sshll.u32 %s5184_s25, 4  ;;  %s66_s26 = int_to_ptr.vmem [resolvable:$true] %s65_s26 }
  0x12   :  { %s5039_s27 = scalar_lea.vmem %s66_s26, 128  ;;  %p5044_p6 = scmp.lt.s32.totalorder %s66_s26, %s66_s26 }
  0x13   :  { %p5040_p5 = scmp.ne.s32.totalorder %s66_s26, %s5039_s27  ;;  %p5045_p7 = scmp.lt.s32.totalorder %s5039_s27, %s5039_s27 }
  0x15   :  { %p5046_p8 = por %p5045_p7, %p5044_p6 }
  0x17   :  { %p5047_p9 = pnand %p5046_p8, %p5040_p5 }
  0x19   :  { %5050 = shalt.err (!%p5047_p9)
}
  0x1a   :  { %68 = dma.hbm_to_vmem [thread:$0]  %s5671_s3, 128, %s66_s26, [#allocation8]  }
  0x1b   :  { %s5185_s30 = smov [#allocation10]   ;;  %s5186_s17 = smov [#allocation2]  }
  0x1c   :  { %s90_s16 = sshll.u32 %s5185_s30, 4  ;;  %s30_s18 = sshll.u32 %s5186_s17, 4  ;;  %s91_s16 = int_to_ptr.vmem [resolvable:$true] %s90_s16  ;;  %s31_s18 = int_to_ptr.vmem [resolvable:$true] %s30_s18 }
  0x1d   :  { %s5059_s1 = scalar_lea.vmem %s91_s16, 8192  ;;  %p5064_p11 = scmp.lt.s32.totalorder %s91_s16, %s91_s16 }
  0x1e   :  { %p5060_p10 = scmp.ne.s32.totalorder %s91_s16, %s5059_s1  ;;  %p5065_p12 = scmp.lt.s32.totalorder %s5059_s1, %s5059_s1 }
  0x20   :  { %p5066_p13 = por %p5065_p12, %p5064_p11 }
  0x22   :  { %p5067_p0 = pnand %p5066_p13, %p5060_p10 }
  0x24   :  { %5070 = shalt.err (!%p5067_p0)
}
  0x25   :  { %s5187_s19 = smov 128   ;;  %s5188_s20 = smov 8  }
  0x26   :  { %96 = dma.hbm_to_vmem [thread:$0]  %s5675_s7, 8192, %s91_s16, [#allocation11], %s5187_s19, %s5187_s19, %s5188_s20  }
  0x27   :  { %s5079_s3 = scalar_lea.vmem %s31_s18, 256  ;;  %p5084_p2 = scmp.lt.s32.totalorder %s31_s18, %s31_s18 }
  0x28   :  { %p5080_p1 = scmp.ne.s32.totalorder %s31_s18, %s5079_s3  ;;  %p5085_p3 = scmp.lt.s32.totalorder %s5079_s3, %s5079_s3 }
  0x2a   :  { %p5086_p4 = por %p5085_p3, %p5084_p2 }
  0x2c   :  { %p5087_p5 = pnand %p5086_p4, %p5080_p1 }
  0x2e   :  { %5090 = shalt.err (!%p5087_p5)
}
  0x2f   :  { %36 = dma.hbm_to_vmem [thread:$0]  %s5668_s0, 256, %s31_s18, [#allocation3], %s5187_s19, %s5187_s19, %s5188_s20  }
  0x30   :  { %s5189_s25 = smov [#allocation6]   ;;  %s5190_s27 = smov [#allocation9]  }
  0x31   :  { %s55_s26 = sshll.u32 %s5189_s25, 4  ;;  %s74_s28 = sshll.u32 %s5190_s27, 4  ;;  %s56_s26 = int_to_ptr.vmem [resolvable:$true] %s55_s26  ;;  %s75_s28 = int_to_ptr.vmem [resolvable:$true] %s74_s28 }
  0x32   :  { %s5099_s29 = scalar_lea.vmem %s56_s26, 128  ;;  %p5104_p7 = scmp.lt.s32.totalorder %s56_s26, %s56_s26 }
  0x33   :  { %p5100_p6 = scmp.ne.s32.totalorder %s56_s26, %s5099_s29  ;;  %p5105_p8 = scmp.lt.s32.totalorder %s5099_s29, %s5099_s29 }
  0x35   :  { %p5106_p9 = por %p5105_p8, %p5104_p7 }
  0x37   :  { %p5107_p10 = pnand %p5106_p9, %p5100_p6 }
  0x39   :  { %5110 = shalt.err (!%p5107_p10)
}
  0x3a   :  { %58 = dma.hbm_to_vmem [thread:$0]  %s5670_s2, 128, %s56_s26, [#allocation5]  }
  0x3b   :  { %s5119_s16 = scalar_lea.vmem %s75_s28, 32768  ;;  %p5124_p12 = scmp.lt.s32.totalorder %s75_s28, %s75_s28 }
  0x3c   :  { %p5120_p11 = scmp.ne.s32.totalorder %s75_s28, %s5119_s16  ;;  %p5125_p13 = scmp.lt.s32.totalorder %s5119_s16, %s5119_s16 }
  0x3e   :  { %p5126_p0 = por %p5125_p13, %p5124_p12 }
  0x40   :  { %p5127_p1 = pnand %p5126_p0, %p5120_p11 }
  0x42   :  { %5130 = shalt.err (!%p5127_p1)
}
  0x43   :  { %s5191_s0 = smov 256   ;;  %s5192_s17 = smov 16  }
  0x44   :  { %80 = dma.hbm_to_vmem [thread:$0]  %s5672_s4, 32768, %s75_s28, [#allocation8], %s5191_s0, %s5191_s0, %s5192_s17  }
  0x45   :  { %s5193_s19 = smov [#allocation12]  }
  0x46   :  { %s106_s20 = sshll.u32 %s5193_s19, 4  ;;  %s107_s20 = int_to_ptr.vmem [resolvable:$true] %s106_s20 }
  0x47   :  { %s5139_s21 = scalar_lea.vmem %s107_s20, 2048  ;;  %p5144_p3 = scmp.lt.s32.totalorder %s107_s20, %s107_s20 }
  0x48   :  { %p5140_p2 = scmp.ne.s32.totalorder %s107_s20, %s5139_s21  ;;  %p5145_p4 = scmp.lt.s32.totalorder %s5139_s21, %s5139_s21 }
  0x4a   :  { %p5146_p5 = por %p5145_p4, %p5144_p3 }
  0x4c   :  { %p5147_p6 = pnand %p5146_p5, %p5140_p2 }
  0x4e   :  { %5150 = shalt.err (!%p5147_p6)
}
  0x4f   :  { %s5194_s2 = smov 64   ;;  %s5195_s22 = smov 4  }
  0x50   :  { %112 = dma.hbm_to_vmem [thread:$0]  %s5678_s10, 2048, %s107_s20, [#allocation11], %s5194_s2, %s5194_s2, %s5195_s22  }
  0x51   :  { %s5196_s24 = smov [#allocation13]  }
  0x52   :  { %s122_s25 = sshll.u32 %s5196_s24, 4  ;;  %s123_s25 = int_to_ptr.vmem [resolvable:$true] %s122_s25 }
  0x53   :  { %s5159_s4 = scalar_lea.vmem %s123_s25, 1024  ;;  %p5164_p8 = scmp.lt.s32.totalorder %s123_s25, %s123_s25 }
  0x54   :  { %p5160_p7 = scmp.ne.s32.totalorder %s123_s25, %s5159_s4  ;;  %p5165_p9 = scmp.lt.s32.totalorder %s5159_s4, %s5159_s4 }
  0x56   :  { %p5166_p10 = por %p5165_p9, %p5164_p8 }
  0x58   :  { %p5167_p11 = pnand %p5166_p10, %p5160_p7 }
  0x5a   :  { %5170 = shalt.err (!%p5167_p11)
}
  0x5b   :  { %128 = dma.hbm_to_vmem [thread:$0]  %s5681_s13, 1024, %s123_s25, [#allocation14], %s5194_s2, %s5194_s2, %s5195_s22  }
  0x5c   :  { %5171 = dma.done.wait [#allocation3], 256  }
  0x5d   :  { %5172 = vsyncadd [#allocation3], 4294967040 }
  0x5e   :  { %5173 = dma.done.wait [#allocation5], 4224  }
  0x5f   :  { %5174 = vsyncadd [#allocation5], 4294963072 }
  0x60   :  { %5175 = dma.done.wait [#allocation8], 32896  }
  0x61   :  { %5176 = vsyncadd [#allocation8], 4294934400 }
  0x62   :  { %5177 = dma.done.wait [#allocation11], 10240  }
  0x63   :  { %5178 = vsyncadd [#allocation11], 4294957056 }
  0x64   :  { %5179 = dma.done.wait [#allocation14], 1024  }
  0x65   :  { %5180 = vsyncadd [#allocation14], 4294966272  ;;  %v5197_v0 = vmov 0   ;;  %v183_v1 = vld [vmem:[#allocation4 + $0xc0] sm:$0xff]  ;;  %v184_v3 = vld [vmem:[#allocation4 + $0xc8] sm:$0xff]  ;;  %vm351_vm0 = vcmask 523264  }
  0x66   :  { %387 = vmatprep.mubr.bf16.mxu0 %v5197_v0  ;;  %430 = vmatprep.mubr.bf16.mxu1 %v5197_v0  ;;  %v187_v2 = vld [vmem:[#allocation4 + $0xe0] sm:$0xff]  ;;  %v188_v5 = vld [vmem:[#allocation4 + $0xe8] sm:$0xff]  ;;  %v156_v31 = vld [vmem:[#allocation2] sm:$0xff]  ;;  %vm5200_vm1 = vmmov 0  }
  0x67   :  { %v4040_v4 = vcombine.high %v183_v1, %v187_v2  ;;  %v4039_v6 = vcombine.low %v183_v1, %v187_v2  ;;  %v175_v7 = vld [vmem:[#allocation4 + $0x80] sm:$0xff]  ;;  %v4042_v9 = vcombine.high %v184_v3, %v188_v5  ;;  %v4041_v10 = vcombine.low %v184_v3, %v188_v5  ;;  %v176_v12 = vld [vmem:[#allocation4 + $0x88] sm:$0xff]  ;;  %v157_v32 = vld [vmem:[#allocation2 + $0x8] sm:$0xff] }
  0x68   :  { %v179_v8 = vld [vmem:[#allocation4 + $0xa0] sm:$0xff]  ;;  %v180_v13 = vld [vmem:[#allocation4 + $0xa8] sm:$0xff]  ;;  %v185_v33 = vld [vmem:[#allocation4 + $0xd0] sm:$0xff]  ;;  %v158_v45 = vpack.c.bf16 %v157_v32, %v156_v31 }
  0x69   :  { %v4032_v11 = vcombine.high %v175_v7, %v179_v8  ;;  %v167_v14 = vld [vmem:[#allocation4 + $0x40] sm:$0xff]  ;;  %363 = vmatprep.subr.bf16.mxu0 %v4040_v4  ;;  %v4034_v15 = vcombine.high %v176_v12, %v180_v13  ;;  %v168_v17 = vld [vmem:[#allocation4 + $0x48] sm:$0xff]  ;;  %406 = vmatprep.subr.bf16.mxu1 %v4042_v9  ;;  %v4031_v19 = vcombine.low %v175_v7, %v179_v8  ;;  %v189_v34 = vld [vmem:[#allocation4 + $0xf0] sm:$0xff] }
  0x6a   :  { %v171_v16 = vld [vmem:[#allocation4 + $0x60] sm:$0xff]  ;;  %v172_v18 = vld [vmem:[#allocation4 + $0x68] sm:$0xff]  ;;  %364 = vmatpush1.bf16.msra.mxu0 %v4039_v6  ;;  %407 = vmatpush1.bf16.msra.mxu1 %v4041_v10  ;;  %v4033_v20 = vcombine.low %v176_v12, %v180_v13  ;;  %v186_v35 = vld [vmem:[#allocation4 + $0xd8] sm:$0xff]  ;;  %v4044_v41 = vcombine.high %v185_v33, %v189_v34  ;;  %v4043_v46 = vcombine.low %v185_v33, %v189_v34 }
  0x6b   :  { %365 = vmatprep.subr.bf16.mxu0 %v4032_v11  ;;  %v4024_v21 = vcombine.high %v167_v14, %v171_v16  ;;  %408 = vmatprep.subr.bf16.mxu1 %v4034_v15  ;;  %v4026_v22 = vcombine.high %v168_v17, %v172_v18  ;;  %v159_v23 = vld [vmem:[#allocation4] sm:$0xff]  ;;  %v160_v25 = vld [vmem:[#allocation4 + $0x8] sm:$0xff]  ;;  %v4023_v27 = vcombine.low %v167_v14, %v171_v16  ;;  %v190_v36 = vld [vmem:[#allocation4 + $0xf8] sm:$0xff] }
  0x6c   :  { %v163_v24 = vld [vmem:[#allocation4 + $0x20] sm:$0xff]  ;;  %v164_v26 = vld [vmem:[#allocation4 + $0x28] sm:$0xff]  ;;  %v4025_v28 = vcombine.low %v168_v17, %v172_v18  ;;  %v177_v38 = vld [vmem:[#allocation4 + $0x90] sm:$0xff]  ;;  %v4046_v44 = vcombine.high %v186_v35, %v190_v36  ;;  %v4045_v49 = vcombine.low %v186_v35, %v190_v36 }
  0x6d   :  { %v4016_v29 = vcombine.high %v159_v23, %v163_v24  ;;  %v4018_v30 = vcombine.high %v160_v25, %v164_v26  ;;  %v4015_v37 = vcombine.low %v159_v23, %v163_v24  ;;  %v181_v39 = vld [vmem:[#allocation4 + $0xb0] sm:$0xff]  ;;  %v4017_v40 = vcombine.low %v160_v25, %v164_v26  ;;  %v178_v42 = vld [vmem:[#allocation4 + $0x98] sm:$0xff] }
  0x6e   :  { %366 = vmatpush1.bf16.msra.mxu0 %v4031_v19  ;;  %409 = vmatpush1.bf16.msra.mxu1 %v4033_v20  ;;  %v182_v43 = vld [vmem:[#allocation4 + $0xb8] sm:$0xff]  ;;  %v169_v47 = vld [vmem:[#allocation4 + $0x50] sm:$0xff]  ;;  %v4036_v50 = vcombine.high %v177_v38, %v181_v39  ;;  %v4035_v54 = vcombine.low %v177_v38, %v181_v39 }
  0x6f   :  { %367 = vmatprep.subr.bf16.mxu0 %v4024_v21  ;;  %410 = vmatprep.subr.bf16.mxu1 %v4026_v22  ;;  %v173_v48 = vld [vmem:[#allocation4 + $0x70] sm:$0xff]  ;;  %v170_v51 = vld [vmem:[#allocation4 + $0x58] sm:$0xff]  ;;  %v4038_v53 = vcombine.high %v178_v42, %v182_v43  ;;  %v4037_v57 = vcombine.low %v178_v42, %v182_v43 }
  0x70   :  { %v174_v52 = vld [vmem:[#allocation4 + $0x78] sm:$0xff]  ;;  %v161_v55 = vld [vmem:[#allocation4 + $0x10] sm:$0xff]  ;;  %v4028_v58 = vcombine.high %v169_v47, %v173_v48  ;;  %v4027_v62 = vcombine.low %v169_v47, %v173_v48 }
  0x71   :  { %v165_v56 = vld [vmem:[#allocation4 + $0x30] sm:$0xff]  ;;  %v162_v59 = vld [vmem:[#allocation4 + $0x18] sm:$0xff]  ;;  %v4030_v61 = vcombine.high %v170_v51, %v174_v52  ;;  %v4029_v63 = vcombine.low %v170_v51, %v174_v52 }
  0x72   :  { %368 = vmatpush1.bf16.msra.mxu0 %v4023_v27  ;;  %411 = vmatpush1.bf16.msra.mxu1 %v4025_v28  ;;  %v166_v60 = vld [vmem:[#allocation4 + $0x38] sm:$0xff]  ;;  %v4020_v1 = vcombine.high %v161_v55, %v165_v56  ;;  %v4019_v3 = vcombine.low %v161_v55, %v165_v56  ;;  %v4474_v5 = vld [vmem:[#allocation9 + $0x2e4] ss:$16 sps:$4 sm:$0xff]   ;;  %v4469_v6 = vld [vmem:[#allocation9 + $0xe0] ss:$16 sps:$4 sm:$0xff]  }
  0x73   :  { %369 = vmatprep.subr.bf16.mxu0 %v4016_v29  ;;  %412 = vmatprep.subr.bf16.mxu1 %v4018_v30  ;;  %v4022_v2 = vcombine.high %v162_v59, %v166_v60  ;;  %v4021_v4 = vcombine.low %v162_v59, %v166_v60  ;;  %v4472_v7 = vld [vmem:[#allocation9 + $0x2e0] ss:$16 sps:$4 sm:$0xff]   ;;  %v4477_v8 = vld [vmem:[#allocation9 + $0xc4] ss:$16 sps:$4 sm:$0xff]  }
  0x74   :  { %v4480_v9 = vld [vmem:[#allocation9 + $0x2c4] ss:$16 sps:$4 sm:$0xff]   ;;  %v4475_v10 = vld [vmem:[#allocation9 + $0xc0] ss:$16 sps:$4 sm:$0xff]  }
  0x75   :  { %v4478_v11 = vld [vmem:[#allocation9 + $0x2c0] ss:$16 sps:$4 sm:$0xff]   ;;  %v4483_v12 = vld [vmem:[#allocation9 + $0xa4] ss:$16 sps:$4 sm:$0xff]  }
  0x76   :  { %370 = vmatpush1.bf16.msra.mxu0 %v4015_v37  ;;  %413 = vmatpush1.bf16.msra.mxu1 %v4017_v40  ;;  %v4486_v13 = vld [vmem:[#allocation9 + $0x2a4] ss:$16 sps:$4 sm:$0xff]   ;;  %v4481_v14 = vld [vmem:[#allocation9 + $0xa0] ss:$16 sps:$4 sm:$0xff]  }
  0x77   :  { %449 = vmatprep.subr.bf16.mxu0 %v4044_v41  ;;  %492 = vmatprep.subr.bf16.mxu1 %v4046_v44  ;;  %v4484_v15 = vld [vmem:[#allocation9 + $0x2a0] ss:$16 sps:$4 sm:$0xff]   ;;  %v4489_v16 = vld [vmem:[#allocation9 + $0x84] ss:$16 sps:$4 sm:$0xff]  }
  0x78   :  { %v4492_v17 = vld [vmem:[#allocation9 + $0x284] ss:$16 sps:$4 sm:$0xff]   ;;  %v4487_v18 = vld [vmem:[#allocation9 + $0x80] ss:$16 sps:$4 sm:$0xff]  }
  0x79   :  { %4047 = vmatmul.mubr.msk.bf16.vlgmr.msra.gmra.mxu0 %vm351_vm0, %v158_v45  ;;  %4048 = vmatmul.mubr.msk.bf16.vlgmr.msra.gmra.mxu1 %vm351_vm0, %v158_v45  ;;  %v4490_v19 = vld [vmem:[#allocation9 + $0x280] ss:$16 sps:$4 sm:$0xff]   ;;  %v4495_v20 = vld [vmem:[#allocation9 + $0x64] ss:$16 sps:$4 sm:$0xff]  }
  0x7a   :  { %450 = vmatpush1.bf16.msra.mxu0 %v4043_v46  ;;  %493 = vmatpush1.bf16.msra.mxu1 %v4045_v49  ;;  %v4498_v21 = vld [vmem:[#allocation9 + $0x264] ss:$16 sps:$4 sm:$0xff]   ;;  %v4493_v22 = vld [vmem:[#allocation9 + $0x60] ss:$16 sps:$4 sm:$0xff]  }
  0x7b   :  { %451 = vmatprep.subr.bf16.mxu0 %v4036_v50  ;;  %494 = vmatprep.subr.bf16.mxu1 %v4038_v53  ;;  %v4496_v23 = vld [vmem:[#allocation9 + $0x260] ss:$16 sps:$4 sm:$0xff]   ;;  %v4501_v24 = vld [vmem:[#allocation9 + $0x44] ss:$16 sps:$4 sm:$0xff]  }
  0x7c   :  { %473 = vmatprep.mubr.bf16.mxu0 %v5197_v0  ;;  %516 = vmatprep.mubr.bf16.mxu1 %v5197_v0  ;;  %v4471_v0 = vld [vmem:[#allocation9 + $0xe4] ss:$16 sps:$4 sm:$0xff]   ;;  %v4499_v26 = vld [vmem:[#allocation9 + $0x40] ss:$16 sps:$4 sm:$0xff]  }
  0x7d   :  { %v4504_v25 = vld [vmem:[#allocation9 + $0x244] ss:$16 sps:$4 sm:$0xff]   ;;  %v4502_v27 = vld [vmem:[#allocation9 + $0x240] ss:$16 sps:$4 sm:$0xff]  }
  0x7e   :  { %452 = vmatpush1.bf16.msra.mxu0 %v4035_v54  ;;  %495 = vmatpush1.bf16.msra.mxu1 %v4037_v57  ;;  %v4507_v28 = vld [vmem:[#allocation9 + $0x24] ss:$16 sps:$4 sm:$0xff]   ;;  %v4505_v30 = vld [vmem:[#allocation9 + $0x20] ss:$16 sps:$4 sm:$0xff]  }
  0x7f   :  { %453 = vmatprep.subr.bf16.mxu0 %v4028_v58  ;;  %496 = vmatprep.subr.bf16.mxu1 %v4030_v61  ;;  %v4510_v29 = vld [vmem:[#allocation9 + $0x224] ss:$16 sps:$4 sm:$0xff]   ;;  %v4508_v31 = vld [vmem:[#allocation9 + $0x220] ss:$16 sps:$4 sm:$0xff]  }
  0x80   :  { %v4513_v32 = vld [vmem:[#allocation9 + $0x4] ss:$16 sps:$4 sm:$0xff]   ;;  %v4511_v34 = vld [vmem:[#allocation9] ss:$16 sps:$4 sm:$0xff]  }
  0x81   :  { %v4516_v33 = vld [vmem:[#allocation9 + $0x204] ss:$16 sps:$4 sm:$0xff]   ;;  %v4514_v35 = vld [vmem:[#allocation9 + $0x200] ss:$16 sps:$4 sm:$0xff]  }
  0x82   :  { %454 = vmatpush1.bf16.msra.mxu0 %v4027_v62  ;;  %497 = vmatpush1.bf16.msra.mxu1 %v4029_v63  ;;  %v4519_v36 = vld [vmem:[#allocation9 + $0x1e4] ss:$16 sps:$4 sm:$0xff]   ;;  %v4517_v38 = vld [vmem:[#allocation9 + $0x1e0] ss:$16 sps:$4 sm:$0xff]  }
  0x83   :  { %455 = vmatprep.subr.bf16.mxu0 %v4020_v1  ;;  %498 = vmatprep.subr.bf16.mxu1 %v4022_v2  ;;  %v4522_v37 = vld [vmem:[#allocation9 + $0x3e4] ss:$16 sps:$4 sm:$0xff]   ;;  %v4520_v39 = vld [vmem:[#allocation9 + $0x3e0] ss:$16 sps:$4 sm:$0xff]  }
  0x84   :  { %v4525_v40 = vld [vmem:[#allocation9 + $0x1c4] ss:$16 sps:$4 sm:$0xff]   ;;  %v4523_v42 = vld [vmem:[#allocation9 + $0x1c0] ss:$16 sps:$4 sm:$0xff]  }
  0x85   :  { %v4528_v41 = vld [vmem:[#allocation9 + $0x3c4] ss:$16 sps:$4 sm:$0xff]   ;;  %v4526_v43 = vld [vmem:[#allocation9 + $0x3c0] ss:$16 sps:$4 sm:$0xff]  }
  0x86   :  { %456 = vmatpush1.bf16.msra.mxu0 %v4019_v3  ;;  %499 = vmatpush1.bf16.msra.mxu1 %v4021_v4  ;;  %v4531_v44 = vld [vmem:[#allocation9 + $0x1a4] ss:$16 sps:$4 sm:$0xff]   ;;  %v4529_v46 = vld [vmem:[#allocation9 + $0x1a0] ss:$16 sps:$4 sm:$0xff]  }
  0x87   :  { %2505 = vmatprep.subr.bf16.mxu0 %v4471_v0  ;;  %2548 = vmatprep.subr.bf16.mxu1 %v4474_v5  ;;  %v4532_v47 = vld [vmem:[#allocation9 + $0x3a0] ss:$16 sps:$4 sm:$0xff]   ;;  %v4537_v48 = vld [vmem:[#allocation9 + $0x184] ss:$16 sps:$4 sm:$0xff]  }
  0x88   :  { %v4540_v49 = vld [vmem:[#allocation9 + $0x384] ss:$16 sps:$4 sm:$0xff]   ;;  %v4535_v50 = vld [vmem:[#allocation9 + $0x180] ss:$16 sps:$4 sm:$0xff]  }
  0x89   :  { %4049 = vmatmul.mubr.msk.bf16.vlgmr.msra.gmra.mxu0 %vm351_vm0, %v158_v45  ;;  %4050 = vmatmul.mubr.msk.bf16.vlgmr.msra.gmra.mxu1 %vm351_vm0, %v158_v45  ;;  %v4534_v45 = vld [vmem:[#allocation9 + $0x3a4] ss:$16 sps:$4 sm:$0xff]   ;;  %v4538_v51 = vld [vmem:[#allocation9 + $0x380] ss:$16 sps:$4 sm:$0xff]  }
  0x8a   :  { %2506 = vmatpush1.bf16.msra.mxu0 %v4469_v6  ;;  %2549 = vmatpush1.bf16.msra.mxu1 %v4472_v7  ;;  %v4543_v52 = vld [vmem:[#allocation9 + $0x164] ss:$16 sps:$4 sm:$0xff]   ;;  %v4541_v54 = vld [vmem:[#allocation9 + $0x160] ss:$16 sps:$4 sm:$0xff]  }
  0x8b   :  { %2507 = vmatprep.subr.bf16.mxu0 %v4477_v8  ;;  %2550 = vmatprep.subr.bf16.mxu1 %v4480_v9  ;;  %v4546_v53 = vld [vmem:[#allocation9 + $0x364] ss:$16 sps:$4 sm:$0xff]   ;;  %v4544_v55 = vld [vmem:[#allocation9 + $0x360] ss:$16 sps:$4 sm:$0xff]  }
  0x8c   :  { %v4549_v56 = vld [vmem:[#allocation9 + $0x144] ss:$16 sps:$4 sm:$0xff]   ;;  %v4547_v58 = vld [vmem:[#allocation9 + $0x140] ss:$16 sps:$4 sm:$0xff]  }
  0x8d   :  { %v4552_v57 = vld [vmem:[#allocation9 + $0x344] ss:$16 sps:$4 sm:$0xff]   ;;  %v4550_v59 = vld [vmem:[#allocation9 + $0x340] ss:$16 sps:$4 sm:$0xff]  }
  0x8e   :  { %2508 = vmatpush1.bf16.msra.mxu0 %v4475_v10  ;;  %2551 = vmatpush1.bf16.msra.mxu1 %v4478_v11  ;;  %v4555_v60 = vld [vmem:[#allocation9 + $0x124] ss:$16 sps:$4 sm:$0xff]   ;;  %v4553_v62 = vld [vmem:[#allocation9 + $0x120] ss:$16 sps:$4 sm:$0xff]  }
  0x8f   :  { %2509 = vmatprep.subr.bf16.mxu0 %v4483_v12  ;;  %2552 = vmatprep.subr.bf16.mxu1 %v4486_v13  ;;  %v4558_v61 = vld [vmem:[#allocation9 + $0x324] ss:$16 sps:$4 sm:$0xff]   ;;  %v4556_v63 = vld [vmem:[#allocation9 + $0x320] ss:$16 sps:$4 sm:$0xff]  }
  0x90   :  { %v4559_v1 = vld [vmem:[#allocation9 + $0x100] ss:$16 sps:$4 sm:$0xff]   ;;  %v4561_v2 = vld [vmem:[#allocation9 + $0x104] ss:$16 sps:$4 sm:$0xff]  }
  0x91   :  { %v4562_v3 = vld [vmem:[#allocation9 + $0x300] ss:$16 sps:$4 sm:$0xff]   ;;  %v4564_v4 = vld [vmem:[#allocation9 + $0x304] ss:$16 sps:$4 sm:$0xff]  }
  0x92   :  { %2510 = vmatpush1.bf16.msra.mxu0 %v4481_v14  ;;  %2553 = vmatpush1.bf16.msra.mxu1 %v4484_v15  ;;  %v4567_v0 = vld [vmem:[#allocation9 + $0x4e4] ss:$16 sps:$4 sm:$0xff]  }
  0x93   :  { %2511 = vmatprep.subr.bf16.mxu0 %v4489_v16  ;;  %2554 = vmatprep.subr.bf16.mxu1 %v4492_v17  ;;  %v4570_v5 = vld [vmem:[#allocation9 + $0x6e4] ss:$16 sps:$4 sm:$0xff]  }
  0x96   :  { %2512 = vmatpush1.bf16.msra.mxu0 %v4487_v18  ;;  %2555 = vmatpush1.bf16.msra.mxu1 %v4490_v19 }
  0x97   :  { %2513 = vmatprep.subr.bf16.mxu0 %v4495_v20  ;;  %2556 = vmatprep.subr.bf16.mxu1 %v4498_v21 }
  0x9a   :  { %2514 = vmatpush1.bf16.msra.mxu0 %v4493_v22  ;;  %2557 = vmatpush1.bf16.msra.mxu1 %v4496_v23 }
  0x9b   :  { %2515 = vmatprep.subr.bf16.mxu0 %v4501_v24  ;;  %2558 = vmatprep.subr.bf16.mxu1 %v4504_v25 }
  0x9e   :  { %2516 = vmatpush1.bf16.msra.mxu0 %v4499_v26  ;;  %2559 = vmatpush1.bf16.msra.mxu1 %v4502_v27 }
  0x9f   :  { %2517 = vmatprep.subr.bf16.mxu0 %v4507_v28  ;;  %2560 = vmatprep.subr.bf16.mxu1 %v4510_v29 }
  0xa2   :  { %2518 = vmatpush1.bf16.msra.mxu0 %v4505_v30  ;;  %2561 = vmatpush1.bf16.msra.mxu1 %v4508_v31 }
  0xa3   :  { %2519 = vmatprep.subr.bf16.mxu0 %v4513_v32  ;;  %2562 = vmatprep.subr.bf16.mxu1 %v4516_v33 }
  0xa6   :  { %2520 = vmatpush1.bf16.msra.mxu0 %v4511_v34  ;;  %2563 = vmatpush1.bf16.msra.mxu1 %v4514_v35 }
  0xa7   :  { %2521 = vmatprep.subr.bf16.mxu0 %v4519_v36  ;;  %2564 = vmatprep.subr.bf16.mxu1 %v4522_v37 }
  0xaa   :  { %2522 = vmatpush2.bf16.msra.mxu0 %v4517_v38  ;;  %2565 = vmatpush2.bf16.msra.mxu1 %v4520_v39 }
  0xab   :  { %2523 = vmatprep.subr.bf16.mxu0 %v4525_v40  ;;  %2566 = vmatprep.subr.bf16.mxu1 %v4528_v41 }
  0xae   :  { %2524 = vmatpush2.bf16.msra.mxu0 %v4523_v42  ;;  %2567 = vmatpush2.bf16.msra.mxu1 %v4526_v43 }
  0xaf   :  { %2525 = vmatprep.subr.bf16.mxu0 %v4531_v44  ;;  %2568 = vmatprep.subr.bf16.mxu1 %v4534_v45 }
  0xb2   :  { %2526 = vmatpush2.bf16.msra.mxu0 %v4529_v46  ;;  %2569 = vmatpush2.bf16.msra.mxu1 %v4532_v47 }
  0xb3   :  { %2527 = vmatprep.subr.bf16.mxu0 %v4537_v48  ;;  %2570 = vmatprep.subr.bf16.mxu1 %v4540_v49 }
  0xb6   :  { %2528 = vmatpush2.bf16.msra.mxu0 %v4535_v50  ;;  %2571 = vmatpush2.bf16.msra.mxu1 %v4538_v51 }
  0xb7   :  { %2529 = vmatprep.subr.bf16.mxu0 %v4543_v52  ;;  %2572 = vmatprep.subr.bf16.mxu1 %v4546_v53 }
  0xba   :  { %2530 = vmatpush2.bf16.msra.mxu0 %v4541_v54  ;;  %2573 = vmatpush2.bf16.msra.mxu1 %v4544_v55 }
  0xbb   :  { %2531 = vmatprep.subr.bf16.mxu0 %v4549_v56  ;;  %2574 = vmatprep.subr.bf16.mxu1 %v4552_v57 }
  0xbe   :  { %2532 = vmatpush2.bf16.msra.mxu0 %v4547_v58  ;;  %2575 = vmatpush2.bf16.msra.mxu1 %v4550_v59 }
  0xbf   :  { %2533 = vmatprep.subr.bf16.mxu0 %v4555_v60  ;;  %2576 = vmatprep.subr.bf16.mxu1 %v4558_v61 }
  0xc2   :  { %2534 = vmatpush2.bf16.msra.mxu0 %v4553_v62  ;;  %2577 = vmatpush2.bf16.msra.mxu1 %v4556_v63 }
  0xc3   :  { %2535 = vmatprep.subr.bf16.mxu0 %v4561_v2  ;;  %2578 = vmatprep.subr.bf16.mxu1 %v4564_v4 }
  0xc6   :  { %2536 = vmatpush2.bf16.msra.mxu0 %v4559_v1  ;;  %2579 = vmatpush2.bf16.msra.mxu1 %v4562_v3 }
  0xc7   :  { %2591 = vmatprep.subr.bf16.mxu0 %v4567_v0  ;;  %2634 = vmatprep.subr.bf16.mxu1 %v4570_v5 }
 0x139   :  { %v5313_v6 = vpop.f32.mrf.mxu0  ;;  %v5315_v7 = vpop.f32.mrf.mxu1 }
 0x13a   :  { %v585_v11 = vmul.f32 %v5313_v6, %v5313_v6  ;;  %v587_v12 = vmul.f32 %v5315_v7, %v5315_v7 }
 0x13b   :  { %v5317_v8 = vpop.f32.mrf.mxu0  ;;  %v5319_v9 = vpop.f32.mrf.mxu1 }
 0x13c   :  { %v586_v16 = vmul.f32 %v5317_v8, %v5317_v8  ;;  %v588_v17 = vmul.f32 %v5319_v9, %v5319_v9 }
 0x13d   :  { %v5321_v10 = vpop.f32.mrf.mxu0  ;;  %v5331_v15 = vpop.f32.mrf.mxu1 }
 0x13e   :  { %v529_v13 = vadd.f32 %v5321_v10, %v5313_v6  ;;  %v593_v14 = vmul.f32 %v5321_v10, %v5321_v10  ;;  %v543_v18 = vadd.f32 %v5331_v15, %v5315_v7  ;;  %v595_v19 = vmul.f32 %v5331_v15, %v5331_v15 }
 0x13f   :  { %v5341_v20 = vpop.f32.mrf.mxu0  ;;  %v5347_v25 = vpop.f32.mrf.mxu1 }
 0x140   :  { %v530_v21 = vrot.slane %v529_v13, 4  ;;  %v601_v22 = vadd.f32 %v593_v14, %v585_v11  ;;  %v536_v23 = vadd.f32 %v5341_v20, %v5317_v8  ;;  %v594_v24 = vmul.f32 %v5341_v20, %v5341_v20 }
 0x141   :  { %v544_v26 = vrot.slane %v543_v18, 4  ;;  %v615_v27 = vadd.f32 %v595_v19, %v587_v12  ;;  %v550_v28 = vadd.f32 %v5347_v25, %v5319_v9  ;;  %v596_v29 = vmul.f32 %v5347_v25, %v5347_v25 }
 0x142   :  { %v531_v30 = vadd.f32 %v530_v21, %v529_v13  ;;  %v602_v31 = vrot.slane %v601_v22, 4  ;;  %v537_v32 = vrot.slane %v536_v23, 4  ;;  %v608_v33 = vadd.f32 %v594_v24, %v586_v16 }
 0x143   :  { %v545_v34 = vadd.f32 %v544_v26, %v543_v18  ;;  %v616_v35 = vrot.slane %v615_v27, 4  ;;  %v551_v36 = vrot.slane %v550_v28, 4  ;;  %v622_v37 = vadd.f32 %v596_v29, %v588_v17 }
 0x144   :  { %v532_v38 = vrot.slane %v531_v30, 2  ;;  %v603_v39 = vadd.f32 %v602_v31, %v601_v22  ;;  %v538_v40 = vadd.f32 %v537_v32, %v536_v23  ;;  %v609_v41 = vrot.slane %v608_v33, 4 }
 0x145   :  { %v546_v42 = vrot.slane %v545_v34, 2  ;;  %v617_v43 = vadd.f32 %v616_v35, %v615_v27  ;;  %v552_v44 = vadd.f32 %v551_v36, %v550_v28  ;;  %v623_v45 = vrot.slane %v622_v37, 4 }
 0x146   :  { %v533_v46 = vadd.f32 %v532_v38, %v531_v30  ;;  %v604_v47 = vrot.slane %v603_v39, 2  ;;  %v539_v48 = vrot.slane %v538_v40, 2  ;;  %v610_v49 = vadd.f32 %v609_v41, %v608_v33 }
 0x147   :  { %v547_v50 = vadd.f32 %v546_v42, %v545_v34  ;;  %v618_v51 = vrot.slane %v617_v43, 2  ;;  %v553_v52 = vrot.slane %v552_v44, 2  ;;  %v624_v53 = vadd.f32 %v623_v45, %v622_v37 }
 0x148   :  { %v534_v54 = vrot.slane %v533_v46, 1  ;;  %v605_v55 = vadd.f32 %v604_v47, %v603_v39  ;;  %v540_v56 = vadd.f32 %v539_v48, %v538_v40  ;;  %v611_v57 = vrot.slane %v610_v49, 2 }
 0x149   :  { %v548_v58 = vrot.slane %v547_v50, 1  ;;  %v619_v59 = vadd.f32 %v618_v51, %v617_v43  ;;  %v554_v60 = vadd.f32 %v553_v52, %v552_v44  ;;  %v625_v61 = vrot.slane %v624_v53, 2  ;;  %v5353_v62 = vpop.f32.mrf.mxu0  ;;  %v5355_v4 = vpop.f32.mrf.mxu1 }
 0x14a   :  { %v535_v63 = vadd.f32 %v534_v54, %v533_v46  ;;  %v606_v1 = vrot.slane %v605_v55, 1  ;;  %v541_v2 = vrot.slane %v540_v56, 1  ;;  %v612_v3 = vadd.f32 %v611_v57, %v610_v49 }
 0x14b   :  { %v549_v0 = vadd.f32 %v548_v58, %v547_v50  ;;  %v620_v5 = vrot.slane %v619_v59, 1  ;;  %v555_v11 = vrot.slane %v554_v60, 1  ;;  %v626_v12 = vadd.f32 %v625_v61, %v624_v53  ;;  %v5357_v13 = vpop.f32.mrf.mxu0  ;;  %v5363_v24 = vpop.f32.mrf.mxu1 }
 0x14c   :  { %v607_v14 = vadd.f32 %v606_v1, %v605_v55  ;;  %v5359_v16 = vmul.f32 0.0625, %v535_v63  ;;  %v542_v17 = vadd.f32 %v541_v2, %v540_v56  ;;  %v613_v18 = vrot.slane %v612_v3, 1 }
 0x14d   :  { %v621_v19 = vadd.f32 %v620_v5, %v619_v59  ;;  %v5361_v21 = vmul.f32 0.0625, %v549_v0  ;;  %v556_v22 = vadd.f32 %v555_v11, %v554_v60  ;;  %v627_v23 = vrot.slane %v626_v12, 1  ;;  %v5375_v32 = vpop.f32.mrf.mxu0  ;;  %v5385_v37 = vpop.f32.mrf.mxu1 }
 0x14e   :  { %v5365_v26 = vmul.f32 0.0625, %v607_v14  ;;  %v5369_v27 = vmul.f32 %v5359_v16, %v5359_v16  ;;  %v614_v28 = vadd.f32 %v613_v18, %v612_v3  ;;  %v5371_v29 = vmul.f32 0.0625, %v542_v17 }
 0x14f   :  { %v628_v30 = vadd.f32 %v627_v23, %v626_v12  ;;  %v5373_v31 = vmul.f32 0.0625, %v556_v22  ;;  %v5377_v33 = vmul.f32 0.0625, %v621_v19  ;;  %v5381_v34 = vmul.f32 %v5361_v21, %v5361_v21  ;;  %v5401_v45 = vpop.f32.mrf.mxu0  ;;  %v5415_v54 = vpop.f32.mrf.mxu1 }
 0x150   :  { %v666_v35 = vmul.f32 0.0625, %v614_v28  ;;  %v674_v36 = vmul.f32 %v5371_v29, %v5371_v29  ;;  %v681_v38 = vsub.f32 %v5365_v26, %v5369_v27  ;;  %v589_v42 = vmul.f32 %v5353_v62, %v5353_v62 }
 0x151   :  { %v5389_v39 = vmul.f32 0.0625, %v628_v30  ;;  %v5393_v40 = vmul.f32 %v5373_v31, %v5373_v31  ;;  %v557_v43 = vadd.f32 %v5375_v32, %v5353_v62  ;;  %v597_v44 = vmul.f32 %v5375_v32, %v5375_v32 }
 0x152   :  { %v682_v41 = vsub.f32 %v666_v35, %v674_v36  ;;  %v683_v46 = vsub.f32 %v5377_v33, %v5381_v34  ;;  %v591_v47 = vmul.f32 %v5355_v4, %v5355_v4  ;;  %v571_v48 = vadd.f32 %v5385_v37, %v5355_v4 }
 0x153   :  { %v599_v49 = vmul.f32 %v5385_v37, %v5385_v37  ;;  %v590_v50 = vmul.f32 %v5357_v13, %v5357_v13  ;;  %v592_v51 = vmul.f32 %v5363_v24, %v5363_v24  ;;  %v558_v52 = vrot.slane %v557_v43, 4 }
 0x154   :  { %v629_v53 = vadd.f32 %v597_v44, %v589_v42  ;;  %v684_v55 = vsub.f32 %v5389_v39, %v5393_v40  ;;  %v572_v56 = vrot.slane %v571_v48, 4  ;;  %v564_v58 = vadd.f32 %v5401_v45, %v5357_v13 }
 0x155   :  { %v643_v57 = vadd.f32 %v599_v49, %v591_v47  ;;  %v690_v59 = vadd.f32 1e-05, %v682_v41  ;;  %v559_v60 = vadd.f32 %v558_v52, %v557_v43  ;;  %v598_v63 = vmul.f32 %v5401_v45, %v5401_v45 }
 0x156   :  { %v630_v61 = vrot.slane %v629_v53, 4  ;;  %v573_v1 = vadd.f32 %v572_v56, %v571_v48  ;;  %v565_v3 = vrot.slane %v564_v58, 4  ;;  %v578_v0 = vadd.f32 %v5415_v54, %v5363_v24 }
 0x157   :  { %v644_v2 = vrot.slane %v643_v57, 4  ;;  %v560_v5 = vrot.slane %v559_v60, 2  ;;  %v636_v12 = vadd.f32 %v598_v63, %v590_v50  ;;  %v600_v14 = vmul.f32 %v5415_v54, %v5415_v54 }
 0x158   :  { %v631_v11 = vadd.f32 %v630_v61, %v629_v53  ;;  %v574_v17 = vrot.slane %v573_v1, 2  ;;  %v566_v19 = vadd.f32 %v565_v3, %v564_v58  ;;  %v579_v22 = vrot.slane %v578_v0, 4 }
 0x159   :  { %v645_v18 = vadd.f32 %v644_v2, %v643_v57  ;;  %v561_v23 = vadd.f32 %v560_v5, %v559_v60  ;;  %v637_v30 = vrot.slane %v636_v12, 4  ;;  %v650_v35 = vadd.f32 %v600_v14, %v592_v51 }
 0x15a   :  { %v632_v28 = vrot.slane %v631_v11, 2  ;;  %v575_v36 = vadd.f32 %v574_v17, %v573_v1  ;;  %v567_v40 = vrot.slane %v566_v19, 2  ;;  %v580_v41 = vadd.f32 %v579_v22, %v578_v0 }
 0x15b   :  { %v646_v39 = vrot.slane %v645_v18, 2  ;;  %v562_v42 = vrot.slane %v561_v23, 1  ;;  %v638_v44 = vadd.f32 %v637_v30, %v636_v12  ;;  %v651_v47 = vrot.slane %v650_v35, 4 }
 0x15c   :  { %v633_v43 = vadd.f32 %v632_v28, %v631_v11  ;;  %v576_v48 = vrot.slane %v575_v36, 1  ;;  %v568_v50 = vadd.f32 %v567_v40, %v566_v19  ;;  %v581_v52 = vrot.slane %v580_v41, 2 }
 0x15d   :  { %v647_v49 = vadd.f32 %v646_v39, %v645_v18  ;;  %v563_v53 = vadd.f32 %v562_v42, %v561_v23  ;;  %v639_v57 = vrot.slane %v638_v44, 2  ;;  %v652_v58 = vadd.f32 %v651_v47, %v650_v35 }
 0x15e   :  { %v634_v56 = vrot.slane %v633_v43, 1  ;;  %v577_v60 = vadd.f32 %v576_v48, %v575_v36  ;;  %v569_v63 = vrot.slane %v568_v50, 1  ;;  %v582_v51 = vadd.f32 %v581_v52, %v580_v41 }
 0x15f   :  { %v648_v61 = vrot.slane %v647_v49, 1  ;;  %v5427_v2 = vmul.f32 0.0625, %v563_v53  ;;  %v640_v3 = vadd.f32 %v639_v57, %v638_v44  ;;  %v653_v0 = vrot.slane %v652_v58, 2 }
 0x160   :  { %v635_v1 = vadd.f32 %v634_v56, %v633_v43  ;;  %v5429_v11 = vmul.f32 0.0625, %v577_v60  ;;  %v570_v12 = vadd.f32 %v569_v63, %v568_v50  ;;  %v583_v14 = vrot.slane %v582_v51, 1 }
 0x161   :  { %v649_v5 = vadd.f32 %v648_v61, %v647_v49  ;;  %v677_v18 = vmul.f32 %v5427_v2, %v5427_v2  ;;  %v641_v19 = vrot.slane %v640_v3, 1  ;;  %v654_v22 = vadd.f32 %v653_v0, %v652_v58 }
 0x162   :  { %v669_v17 = vmul.f32 0.0625, %v635_v1  ;;  %v692_v23 = vadd.f32 1e-05, %v684_v55  ;;  %v679_v30 = vmul.f32 %v5429_v11, %v5429_v11  ;;  %v5435_v35 = vmul.f32 0.0625, %v570_v12 }
 0x163   :  { %v671_v28 = vmul.f32 0.0625, %v649_v5  ;;  %v689_v36 = vadd.f32 1e-05, %v681_v38  ;;  %v642_v40 = vadd.f32 %v641_v19, %v640_v3  ;;  %v584_v41 = vadd.f32 %v583_v14, %v582_v51 }
 0x164   :  { %v685_v39 = vsub.f32 %v669_v17, %v677_v18  ;;  %v691_v42 = vadd.f32 1e-05, %v683_v46  ;;  %v678_v55 = vmul.f32 %v5435_v35, %v5435_v35  ;;  %v655_v43 = vrot.slane %v654_v22, 1 }
 0x165   :  { %4973 = vrsqrt.f32 %v690_v59  ;;  %v687_v44 = vsub.f32 %v671_v28, %v679_v30  ;;  %v670_v47 = vmul.f32 0.0625, %v642_v40  ;;  %v5445_v48 = vmul.f32 0.0625, %v584_v41 }
 0x166   :  { %4975 = vrsqrt.f32 %v692_v23  ;;  %v693_v49 = vadd.f32 1e-05, %v685_v39  ;;  %v656_v26 = vadd.f32 %v655_v43, %v654_v22  ;;  %v5198_v52 = vmov 1966171168  }
 0x167   :  { %4977 = vrsqrt.f32 %v689_v36  ;;  %v686_v27 = vsub.f32 %v670_v47, %v678_v55  ;;  %v680_v38 = vmul.f32 %v5445_v48, %v5445_v48  ;;  %v695_v34 = vadd.f32 1e-05, %v687_v44 }
 0x168   :  { %4979 = vrsqrt.f32 %v691_v42  ;;  %v672_v33 = vmul.f32 0.0625, %v656_v26  ;;  %v718_v53 = vunpack.c.l.s4 %v5198_v52  ;;  %v720_v56 = vlaneseq  ;;  %v527_v42 = vld [vmem:[#allocation6] sm:$0xff] }
 0x169   :  { %v694_v46 = vadd.f32 1e-05, %v686_v27  ;;  %4981 = vrsqrt.f32 %v693_v49 }
 0x16a   :  { %v688_v50 = vsub.f32 %v672_v33, %v680_v38  ;;  %v719_v58 = vunpack.c.0.s8 %v718_v53  ;;  %v5449_v60 = vshrl.u32 %v720_v56, 7 }
 0x16b   :  { %4983 = vrsqrt.f32 %v694_v46 }
 0x16c   :  { %v696_v59 = vadd.f32 1e-05, %v688_v50  ;;  %4985 = vrsqrt.f32 %v695_v34  ;;  %v5452_v3 = vsub.s32 %v719_v58, %v5449_v60  ;;  %v5461_v55 = vsub.s32 0, %v5449_v60 }
 0x16d   :  { %v5464_v44 = vsub.s32 1, %v5449_v60  ;;  %v5467_v47 = vsub.s32 2, %v5449_v60  ;;  %v5470_v49 = vsub.s32 3, %v5449_v60  ;;  %v783_v26 = vsub.s32 4, %v5449_v60 }
 0x16e   :  { %4987 = vrsqrt.f32 %v696_v59  ;;  %v787_v27 = vsub.s32 5, %v5449_v60  ;;  %v791_v38 = vsub.s32 6, %v5449_v60  ;;  %v795_v33 = vsub.s32 7, %v5449_v60 }
 0x172   :  { %v4974_v57 = vpop.eup %4973 }
 0x173   :  { %v4976_v61 = vpop.eup %4975 }
 0x174   :  { %v4978_v63 = vpop.eup %4977 }
 0x175   :  { %v4980_v51 = vpop.eup %4979  ;;  %v713_v1 = vcombine.low %v4978_v63, %v4974_v57 }
 0x176   :  { %v714_v0 = vcombine.low %v4980_v51, %v4976_v61  ;;  %v4982_v5 = vpop.eup %4981 }
 0x177   :  { %v723_v18 = vrot.slane %v713_v1, %v5452_v3 }
 0x178   :  { %v4984_v12 = vpop.eup %4983  ;;  %v730_v19 = vrot.slane %v714_v0, %v5452_v3 }
 0x179   :  { %v715_v14 = vcombine.low %v4982_v5, %v4984_v12  ;;  %v4986_v17 = vpop.eup %4985 }
 0x17a   :  { %v745_v30 = vcombine.low %v723_v18, %v730_v19 }
 0x17b   :  { %v4988_v22 = vpop.eup %4987  ;;  %v737_v23 = vrot.slane %v715_v14, %v5452_v3 }
 0x17c   :  { %v716_v28 = vcombine.low %v4986_v17, %v4988_v22  ;;  %v753_v40 = vrot.slane %v745_v30, %v5452_v3 }
 0x17e   :  { %v744_v36 = vrot.slane %v716_v28, %v5452_v3 }
 0x180   :  { %v746_v39 = vcombine.low %v737_v23, %v744_v36  ;;  %v528_v23 = vld [vmem:[#allocation7] sm:$0xff] }
 0x182   :  { %v760_v41 = vrot.slane %v746_v39, %v5452_v3 }
 0x184   :  { %v761_v43 = vcombine.low %v753_v40, %v760_v41 }
 0x186   :  { %v763_v34 = vmul.f32 %v761_v43, %v527_v42 }
 0x188   :  { %v768_v46 = vrot.slane %v763_v34, %v5461_v55  ;;  %v772_v50 = vrot.slane %v763_v34, %v5464_v44  ;;  %v776_v59 = vrot.slane %v763_v34, %v5467_v47  ;;  %v780_v52 = vrot.slane %v763_v34, %v5470_v49 }
 0x189   :  { %v784_v53 = vrot.slane %v763_v34, %v783_v26  ;;  %v788_v56 = vrot.slane %v763_v34, %v787_v27  ;;  %v792_v57 = vrot.slane %v763_v34, %v791_v38  ;;  %v796_v58 = vrot.slane %v763_v34, %v795_v33 }
 0x18a   :  { %v805_v61 = vmul.f32 %v768_v46, %v5359_v16  ;;  %v806_v63 = vmul.f32 %v772_v50, %v5371_v29  ;;  %v807_v51 = vmul.f32 %v776_v59, %v5361_v21  ;;  %v808_v60 = vmul.f32 %v780_v52, %v5373_v31 }
 0x18b   :  { %v809_v1 = vmul.f32 %v784_v53, %v5427_v2  ;;  %v810_v0 = vmul.f32 %v788_v56, %v5435_v35  ;;  %v811_v5 = vmul.f32 %v792_v57, %v5429_v11  ;;  %v812_v12 = vmul.f32 %v796_v58, %v5445_v48 }
 0x18c   :  { %v821_v14 = vcombine.low %v805_v61, %v806_v63  ;;  %v822_v17 = vcombine.low %v807_v51, %v808_v60  ;;  %v887_v48 = vmul.f32 %v796_v58, %v5415_v54  ;;  %v873_v28 = vmul.f32 %v772_v50, %v5317_v8 }
 0x18d   :  { %v823_v18 = vcombine.low %v809_v1, %v810_v0  ;;  %v824_v19 = vcombine.low %v811_v5, %v812_v12  ;;  %v881_v36 = vmul.f32 %v772_v50, %v5341_v20  ;;  %v875_v39 = vmul.f32 %v780_v52, %v5319_v9 }
 0x18e   :  { %v831_v16 = vrot.slane %v821_v14, %v5452_v3  ;;  %v838_v29 = vrot.slane %v822_v17, %v5452_v3  ;;  %v883_v40 = vmul.f32 %v780_v52, %v5347_v25  ;;  %v872_v41 = vmul.f32 %v768_v46, %v5313_v6 }
 0x18f   :  { %v845_v21 = vrot.slane %v823_v18, %v5452_v3  ;;  %v852_v31 = vrot.slane %v824_v19, %v5452_v3  ;;  %v880_v42 = vmul.f32 %v768_v46, %v5321_v10  ;;  %v874_v43 = vmul.f32 %v776_v59, %v5315_v7  ;;  %v4568_v18 = vld [vmem:[#allocation9 + $0x6e0] ss:$16 sps:$4 sm:$0xff]  }
 0x190   :  { %v853_v22 = vcombine.low %v831_v16, %v838_v29  ;;  %v882_v34 = vmul.f32 %v776_v59, %v5331_v15  ;;  %v877_v54 = vmul.f32 %v788_v56, %v5357_v13  ;;  %v885_v8 = vmul.f32 %v788_v56, %v5401_v45 }
 0x191   :  { %v854_v2 = vcombine.low %v845_v21, %v852_v31  ;;  %v879_v63 = vmul.f32 %v796_v58, %v5363_v24  ;;  %v876_v20 = vmul.f32 %v784_v53, %v5353_v62  ;;  %v884_v9 = vmul.f32 %v784_v53, %v5375_v32  ;;  %v4573_v21 = vld [vmem:[#allocation9 + $0x4c4] ss:$16 sps:$4 sm:$0xff]  }
 0x192   :  { %v861_v35 = vrot.slane %v853_v22, %v5452_v3  ;;  %v878_v25 = vmul.f32 %v792_v57, %v5355_v4  ;;  %v886_v6 = vmul.f32 %v792_v57, %v5385_v37 }
 0x193   :  { %v868_v11 = vrot.slane %v854_v2, %v5452_v3 }
 0x195   :  { %v869_v30 = vcombine.low %v861_v35, %v868_v11  ;;  %v4576_v35 = vld [vmem:[#allocation9 + $0x6c4] ss:$16 sps:$4 sm:$0xff]  }
 0x197   :  { %v871_v61 = vsub.f32 %v528_v23, %v869_v30 }
 0x199   :  { %v920_v10 = vrot.slane %v871_v61, %v795_v33  ;;  %v896_v7 = vrot.slane %v871_v61, %v5464_v44  ;;  %v904_v15 = vrot.slane %v871_v61, %v5470_v49  ;;  %v892_v46 = vrot.slane %v871_v61, %v5461_v55 }
 0x19a   :  { %v900_v13 = vrot.slane %v871_v61, %v5467_v47  ;;  %v912_v45 = vrot.slane %v871_v61, %v787_v27  ;;  %v908_v50 = vrot.slane %v871_v61, %v783_v26  ;;  %v916_v24 = vrot.slane %v871_v61, %v791_v38  ;;  %v4565_v26 = vld [vmem:[#allocation9 + $0x4e0] ss:$16 sps:$4 sm:$0xff]  }
 0x19b   :  { %v944_v59 = vadd.f32 %v920_v10, %v887_v48  ;;  %v930_v62 = vadd.f32 %v896_v7, %v873_v28  ;;  %v938_v52 = vadd.f32 %v896_v7, %v881_v36  ;;  %v932_v32 = vadd.f32 %v904_v15, %v875_v39  ;;  %v4571_v39 = vld [vmem:[#allocation9 + $0x4c0] ss:$16 sps:$4 sm:$0xff]  }
 0x19c   :  { %v940_v53 = vadd.f32 %v904_v15, %v883_v40  ;;  %v929_v4 = vadd.f32 %v892_v46, %v872_v41  ;;  %v937_v56 = vadd.f32 %v892_v46, %v880_v42  ;;  %v931_v37 = vadd.f32 %v900_v13, %v874_v43  ;;  %v4574_v40 = vld [vmem:[#allocation9 + $0x6c0] ss:$16 sps:$4 sm:$0xff]   ;;  %v4579_v43 = vld [vmem:[#allocation9 + $0x4a4] ss:$16 sps:$4 sm:$0xff]  }
 0x19d   :  { %v946_v33 = vmax.f32 %v930_v62, 0.0  ;;  %v954_v57 = vmax.f32 %v938_v52, 0.0  ;;  %v948_v58 = vmax.f32 %v932_v32, 0.0  ;;  %v939_v51 = vadd.f32 %v900_v13, %v882_v34  ;;  %v4583_v7 = vld [vmem:[#allocation9 + $0x480] ss:$16 sps:$4 sm:$0xff]  }
 0x19e   :  { %v956_v60 = vmax.f32 %v940_v53, 0.0  ;;  %v945_v1 = vmax.f32 %v929_v4, 0.0  ;;  %v953_v0 = vmax.f32 %v937_v56, 0.0  ;;  %v947_v5 = vmax.f32 %v931_v37, 0.0  ;;  %v4586_v15 = vld [vmem:[#allocation9 + $0x680] ss:$16 sps:$4 sm:$0xff]  }
 0x19f   :  { %v5514_v12 = vpack.c.bf16 %v954_v57, %v946_v33  ;;  %v955_v27 = vmax.f32 %v939_v51, 0.0  ;;  %v934_v38 = vadd.f32 %v912_v45, %v877_v54  ;;  %v942_v14 = vadd.f32 %v912_v45, %v885_v8  ;;  %v4582_v8 = vld [vmem:[#allocation9 + $0x6a4] ss:$16 sps:$4 sm:$0xff]   ;;  %v4589_v45 = vld [vmem:[#allocation9 + $0x460] ss:$16 sps:$4 sm:$0xff]  }
 0x1a0   :  { %v5516_v17 = vpack.c.bf16 %v956_v60, %v948_v58  ;;  %v5518_v19 = vpack.c.bf16 %v953_v0, %v945_v1  ;;  %v936_v16 = vadd.f32 %v920_v10, %v879_v63  ;;  %v960_v29 = vmax.f32 %v944_v59, 0.0  ;;  %v4588_v10 = vld [vmem:[#allocation9 + $0x684] ss:$16 sps:$4 sm:$0xff]   ;;  %v4595_v62 = vld [vmem:[#allocation9 + $0x440] ss:$16 sps:$4 sm:$0xff]  }
 0x1a1   :  { %2537 = vmatprep.mubr.bf16.mxu0 %v5514_v12  ;;  %v5521_v31 = vpack.c.bf16 %v955_v27, %v947_v5  ;;  %v950_v22 = vmax.f32 %v934_v38, 0.0  ;;  %v958_v2 = vmax.f32 %v942_v14, 0.0  ;;  %v933_v11 = vadd.f32 %v908_v50, %v876_v20  ;;  %v4591_v46 = vld [vmem:[#allocation9 + $0x464] ss:$16 sps:$4 sm:$0xff]   ;;  %v4598_v52 = vld [vmem:[#allocation9 + $0x640] ss:$16 sps:$4 sm:$0xff]  }
 0x1a2   :  { %2580 = vmatprep.mubr.bf16.mxu1 %v5516_v17  ;;  %2538 = vmatmul.mubr.bf16.vlgmr.msra.gmra.mxu0 %v5518_v19  ;;  %v952_v23 = vmax.f32 %v936_v16, 0.0  ;;  %v941_v48 = vadd.f32 %v908_v50, %v884_v9  ;;  %v935_v28 = vadd.f32 %v916_v24, %v878_v25  ;;  %v943_v30 = vadd.f32 %v916_v24, %v886_v6  ;;  %v4577_v9 = vld [vmem:[#allocation9 + $0x4a0] ss:$16 sps:$4 sm:$0xff]   ;;  %v4585_v6 = vld [vmem:[#allocation9 + $0x484] ss:$16 sps:$4 sm:$0xff]  }
 0x1a3   :  { %2581 = vmatmul.mubr.bf16.vlgmr.msra.gmra.mxu1 %v5521_v31  ;;  %2592 = vmatpush1.bf16.msra.mxu0 %v4565_v26  ;;  %v5526_v36 = vpack.c.bf16 %v958_v2, %v950_v22  ;;  %v949_v41 = vmax.f32 %v933_v11, 0.0  ;;  %v4580_v25 = vld [vmem:[#allocation9 + $0x6a0] ss:$16 sps:$4 sm:$0xff]   ;;  %v4594_v13 = vld [vmem:[#allocation9 + $0x664] ss:$16 sps:$4 sm:$0xff]  }
 0x1a4   :  { %2635 = vmatpush1.bf16.msra.mxu1 %v4568_v18  ;;  %v5528_v42 = vpack.c.bf16 %v960_v29, %v952_v23  ;;  %2593 = vmatprep.subr.bf16.mxu0 %v4573_v21  ;;  %v957_v34 = vmax.f32 %v941_v48, 0.0  ;;  %v951_v61 = vmax.f32 %v935_v28, 0.0  ;;  %v959_v54 = vmax.f32 %v943_v30, 0.0  ;;  %v4592_v50 = vld [vmem:[#allocation9 + $0x660] ss:$16 sps:$4 sm:$0xff]  }
 0x1a5   :  { %2623 = vmatprep.mubr.bf16.mxu0 %v5526_v36  ;;  %2636 = vmatprep.subr.bf16.mxu1 %v4576_v35  ;;  %v4597_v24 = vld [vmem:[#allocation9 + $0x444] ss:$16 sps:$4 sm:$0xff]   ;;  %v4601_v4 = vld [vmem:[#allocation9 + $0x420] ss:$16 sps:$4 sm:$0xff]  }
 0x1a6   :  { %2666 = vmatprep.mubr.bf16.mxu1 %v5528_v42  ;;  %v5532_v63 = vpack.c.bf16 %v957_v34, %v949_v41  ;;  %v5534_v20 = vpack.c.bf16 %v959_v54, %v951_v61  ;;  %v4600_v59 = vld [vmem:[#allocation9 + $0x644] ss:$16 sps:$4 sm:$0xff]   ;;  %v4604_v56 = vld [vmem:[#allocation9 + $0x620] ss:$16 sps:$4 sm:$0xff]  }
 0x1a7   :  { %2594 = vmatpush1.bf16.msra.mxu0 %v4571_v39  ;;  %v4603_v32 = vld [vmem:[#allocation9 + $0x424] ss:$16 sps:$4 sm:$0xff]   ;;  %v4607_v57 = vld [vmem:[#allocation9 + $0x400] ss:$16 sps:$4 sm:$0xff]  }
 0x1a8   :  { %2637 = vmatpush1.bf16.msra.mxu1 %v4574_v40  ;;  %2595 = vmatprep.subr.bf16.mxu0 %v4579_v43  ;;  %v4606_v53 = vld [vmem:[#allocation9 + $0x624] ss:$16 sps:$4 sm:$0xff]   ;;  %v4610_v58 = vld [vmem:[#allocation9 + $0x600] ss:$16 sps:$4 sm:$0xff]  }
 0x1a9   :  { %2638 = vmatprep.subr.bf16.mxu1 %v4582_v8  ;;  %v4609_v37 = vld [vmem:[#allocation9 + $0x404] ss:$16 sps:$4 sm:$0xff]   ;;  %v4613_v1 = vld [vmem:[#allocation9 + $0x5e0] ss:$16 sps:$4 sm:$0xff]  }
 0x1aa   :  { %v4612_v33 = vld [vmem:[#allocation9 + $0x604] ss:$16 sps:$4 sm:$0xff]   ;;  %v4616_v0 = vld [vmem:[#allocation9 + $0x7e0] ss:$16 sps:$4 sm:$0xff]  }
 0x1ab   :  { %2596 = vmatpush1.bf16.msra.mxu0 %v4577_v9  ;;  %v4615_v51 = vld [vmem:[#allocation9 + $0x5e4] ss:$16 sps:$4 sm:$0xff]   ;;  %v4619_v27 = vld [vmem:[#allocation9 + $0x5c0] ss:$16 sps:$4 sm:$0xff]  }
 0x1ac   :  { %2639 = vmatpush1.bf16.msra.mxu1 %v4580_v25  ;;  %2597 = vmatprep.subr.bf16.mxu0 %v4585_v6  ;;  %v4618_v60 = vld [vmem:[#allocation9 + $0x7e4] ss:$16 sps:$4 sm:$0xff]   ;;  %v4622_v38 = vld [vmem:[#allocation9 + $0x7c0] ss:$16 sps:$4 sm:$0xff]  }
 0x1ad   :  { %2640 = vmatprep.subr.bf16.mxu1 %v4588_v10  ;;  %v4621_v5 = vld [vmem:[#allocation9 + $0x5c4] ss:$16 sps:$4 sm:$0xff]   ;;  %v4625_v16 = vld [vmem:[#allocation9 + $0x5a0] ss:$16 sps:$4 sm:$0xff]   ;;  %v4663_v10 = vld [vmem:[#allocation9 + $0xec] ss:$16 sps:$4 sm:$0xff]  }
 0x1ae   :  { %v4624_v26 = vld [vmem:[#allocation9 + $0x7c4] ss:$16 sps:$4 sm:$0xff]   ;;  %v4628_v29 = vld [vmem:[#allocation9 + $0x7a0] ss:$16 sps:$4 sm:$0xff]  }
 0x1af   :  { %2598 = vmatpush1.bf16.msra.mxu0 %v4583_v7  ;;  %v4627_v14 = vld [vmem:[#allocation9 + $0x5a4] ss:$16 sps:$4 sm:$0xff]   ;;  %v4631_v2 = vld [vmem:[#allocation9 + $0x580] ss:$16 sps:$4 sm:$0xff]   ;;  %v4666_v7 = vld [vmem:[#allocation9 + $0x2ec] ss:$16 sps:$4 sm:$0xff]  }
 0x1b0   :  { %2641 = vmatpush1.bf16.msra.mxu1 %v4586_v15  ;;  %2599 = vmatprep.subr.bf16.mxu0 %v4591_v46  ;;  %v4630_v18 = vld [vmem:[#allocation9 + $0x7a4] ss:$16 sps:$4 sm:$0xff]   ;;  %v4634_v35 = vld [vmem:[#allocation9 + $0x780] ss:$16 sps:$4 sm:$0xff]   ;;  %v4661_v15 = vld [vmem:[#allocation9 + $0xe8] ss:$16 sps:$4 sm:$0xff]  }
 0x1b1   :  { %2642 = vmatprep.subr.bf16.mxu1 %v4594_v13  ;;  %v4633_v21 = vld [vmem:[#allocation9 + $0x584] ss:$16 sps:$4 sm:$0xff]   ;;  %v4637_v48 = vld [vmem:[#allocation9 + $0x560] ss:$16 sps:$4 sm:$0xff]   ;;  %v4664_v46 = vld [vmem:[#allocation9 + $0x2e8] ss:$16 sps:$4 sm:$0xff]  }
 0x1b2   :  { %v4636_v22 = vld [vmem:[#allocation9 + $0x784] ss:$16 sps:$4 sm:$0xff]   ;;  %v4640_v28 = vld [vmem:[#allocation9 + $0x760] ss:$16 sps:$4 sm:$0xff]   ;;  %v4669_v13 = vld [vmem:[#allocation9 + $0xcc] ss:$16 sps:$4 sm:$0xff]  }
 0x1b3   :  { %2600 = vmatpush1.bf16.msra.mxu0 %v4589_v45  ;;  %v4639_v11 = vld [vmem:[#allocation9 + $0x564] ss:$16 sps:$4 sm:$0xff]   ;;  %v4643_v40 = vld [vmem:[#allocation9 + $0x540] ss:$16 sps:$4 sm:$0xff]   ;;  %v4672_v45 = vld [vmem:[#allocation9 + $0x2cc] ss:$16 sps:$4 sm:$0xff]  }
 0x1b4   :  { %2643 = vmatpush1.bf16.msra.mxu1 %v4592_v50  ;;  %2601 = vmatprep.subr.bf16.mxu0 %v4597_v24  ;;  %v4642_v23 = vld [vmem:[#allocation9 + $0x764] ss:$16 sps:$4 sm:$0xff]   ;;  %v4646_v41 = vld [vmem:[#allocation9 + $0x740] ss:$16 sps:$4 sm:$0xff]   ;;  %v4667_v50 = vld [vmem:[#allocation9 + $0xc8] ss:$16 sps:$4 sm:$0xff]  }
 0x1b5   :  { %2644 = vmatprep.subr.bf16.mxu1 %v4600_v59  ;;  %v4645_v30 = vld [vmem:[#allocation9 + $0x544] ss:$16 sps:$4 sm:$0xff]   ;;  %v4649_v61 = vld [vmem:[#allocation9 + $0x520] ss:$16 sps:$4 sm:$0xff]   ;;  %v4670_v24 = vld [vmem:[#allocation9 + $0x2c8] ss:$16 sps:$4 sm:$0xff]  }
 0x1b6   :  { %v4648_v39 = vld [vmem:[#allocation9 + $0x744] ss:$16 sps:$4 sm:$0xff]   ;;  %v4652_v54 = vld [vmem:[#allocation9 + $0x720] ss:$16 sps:$4 sm:$0xff]   ;;  %v4675_v59 = vld [vmem:[#allocation9 + $0xac] ss:$16 sps:$4 sm:$0xff]  }
 0x1b7   :  { %2602 = vmatpush1.bf16.msra.mxu0 %v4595_v62  ;;  %v4651_v43 = vld [vmem:[#allocation9 + $0x524] ss:$16 sps:$4 sm:$0xff]   ;;  %v4655_v25 = vld [vmem:[#allocation9 + $0x500] ss:$16 sps:$4 sm:$0xff]   ;;  %v4678_v62 = vld [vmem:[#allocation9 + $0x2ac] ss:$16 sps:$4 sm:$0xff]  }
 0x1b8   :  { %2645 = vmatpush1.bf16.msra.mxu1 %v4598_v52  ;;  %2603 = vmatprep.subr.bf16.mxu0 %v4603_v32  ;;  %v4654_v34 = vld [vmem:[#allocation9 + $0x724] ss:$16 sps:$4 sm:$0xff]   ;;  %v4658_v6 = vld [vmem:[#allocation9 + $0x700] ss:$16 sps:$4 sm:$0xff]   ;;  %v4673_v52 = vld [vmem:[#allocation9 + $0xa8] ss:$16 sps:$4 sm:$0xff]  }
 0x1b9   :  { %2646 = vmatprep.subr.bf16.mxu1 %v4606_v53  ;;  %v4657_v8 = vld [vmem:[#allocation9 + $0x504] ss:$16 sps:$4 sm:$0xff]   ;;  %v4676_v32 = vld [vmem:[#allocation9 + $0x2a8] ss:$16 sps:$4 sm:$0xff]   ;;  %v4681_v53 = vld [vmem:[#allocation9 + $0x8c] ss:$16 sps:$4 sm:$0xff]  }
 0x1ba   :  { %v4660_v9 = vld [vmem:[#allocation9 + $0x704] ss:$16 sps:$4 sm:$0xff]  }
 0x1bb   :  { %2604 = vmatpush1.bf16.msra.mxu0 %v4601_v4  ;;  %v4684_v4 = vld [vmem:[#allocation9 + $0x28c] ss:$16 sps:$4 sm:$0xff]  }
 0x1bc   :  { %2647 = vmatpush1.bf16.msra.mxu1 %v4604_v56  ;;  %2605 = vmatprep.subr.bf16.mxu0 %v4609_v37  ;;  %v4679_v56 = vld [vmem:[#allocation9 + $0x88] ss:$16 sps:$4 sm:$0xff]   ;;  %v4687_v37 = vld [vmem:[#allocation9 + $0x6c] ss:$16 sps:$4 sm:$0xff]  }
 0x1bd   :  { %2648 = vmatprep.subr.bf16.mxu1 %v4612_v33  ;;  %v4690_v33 = vld [vmem:[#allocation9 + $0x26c] ss:$16 sps:$4 sm:$0xff]  }
 0x1bf   :  { %2606 = vmatpush1.bf16.msra.mxu0 %v4607_v57  ;;  %v4688_v57 = vld [vmem:[#allocation9 + $0x268] ss:$16 sps:$4 sm:$0xff]  }
 0x1c0   :  { %2649 = vmatpush1.bf16.msra.mxu1 %v4610_v58  ;;  %2607 = vmatprep.subr.bf16.mxu0 %v4615_v51  ;;  %v4693_v58 = vld [vmem:[#allocation9 + $0x4c] ss:$16 sps:$4 sm:$0xff]  }
 0x1c1   :  { %2650 = vmatprep.subr.bf16.mxu1 %v4618_v60  ;;  %v4696_v51 = vld [vmem:[#allocation9 + $0x24c] ss:$16 sps:$4 sm:$0xff]   ;;  %v4691_v60 = vld [vmem:[#allocation9 + $0x48] ss:$16 sps:$4 sm:$0xff]  }
 0x1c3   :  { %2608 = vmatpush2.bf16.msra.mxu0 %v4613_v1  ;;  %v4694_v1 = vld [vmem:[#allocation9 + $0x248] ss:$16 sps:$4 sm:$0xff]  }
 0x1c4   :  { %2651 = vmatpush2.bf16.msra.mxu1 %v4616_v0  ;;  %2609 = vmatprep.subr.bf16.mxu0 %v4621_v5  ;;  %v4699_v0 = vld [vmem:[#allocation9 + $0x2c] ss:$16 sps:$4 sm:$0xff]  }
 0x1c5   :  { %2652 = vmatprep.subr.bf16.mxu1 %v4624_v26  ;;  %v4702_v5 = vld [vmem:[#allocation9 + $0x22c] ss:$16 sps:$4 sm:$0xff]   ;;  %v4697_v26 = vld [vmem:[#allocation9 + $0x28] ss:$16 sps:$4 sm:$0xff]  }
 0x1c7   :  { %2610 = vmatpush2.bf16.msra.mxu0 %v4619_v27  ;;  %v4700_v27 = vld [vmem:[#allocation9 + $0x228] ss:$16 sps:$4 sm:$0xff]  }
 0x1c8   :  { %2653 = vmatpush2.bf16.msra.mxu1 %v4622_v38  ;;  %2611 = vmatprep.subr.bf16.mxu0 %v4627_v14  ;;  %v4705_v38 = vld [vmem:[#allocation9 + $0xc] ss:$16 sps:$4 sm:$0xff]  }
 0x1c9   :  { %2654 = vmatprep.subr.bf16.mxu1 %v4630_v18  ;;  %v4708_v14 = vld [vmem:[#allocation9 + $0x20c] ss:$16 sps:$4 sm:$0xff]   ;;  %v4703_v18 = vld [vmem:[#allocation9 + $0x8] ss:$16 sps:$4 sm:$0xff]  }
 0x1cb   :  { %2612 = vmatpush2.bf16.msra.mxu0 %v4625_v16  ;;  %v4706_v16 = vld [vmem:[#allocation9 + $0x208] ss:$16 sps:$4 sm:$0xff]  }
 0x1cc   :  { %2655 = vmatpush2.bf16.msra.mxu1 %v4628_v29  ;;  %2613 = vmatprep.subr.bf16.mxu0 %v4633_v21  ;;  %v4711_v29 = vld [vmem:[#allocation9 + $0x1ec] ss:$16 sps:$4 sm:$0xff]  }
 0x1cd   :  { %2656 = vmatprep.subr.bf16.mxu1 %v4636_v22  ;;  %v4714_v21 = vld [vmem:[#allocation9 + $0x3ec] ss:$16 sps:$4 sm:$0xff]   ;;  %v4709_v22 = vld [vmem:[#allocation9 + $0x1e8] ss:$16 sps:$4 sm:$0xff]  }
 0x1cf   :  { %2614 = vmatpush2.bf16.msra.mxu0 %v4631_v2  ;;  %v4712_v2 = vld [vmem:[#allocation9 + $0x3e8] ss:$16 sps:$4 sm:$0xff]  }
 0x1d0   :  { %2657 = vmatpush2.bf16.msra.mxu1 %v4634_v35  ;;  %2615 = vmatprep.subr.bf16.mxu0 %v4639_v11  ;;  %v4717_v35 = vld [vmem:[#allocation9 + $0x1cc] ss:$16 sps:$4 sm:$0xff]  }
 0x1d1   :  { %2658 = vmatprep.subr.bf16.mxu1 %v4642_v23  ;;  %v4720_v11 = vld [vmem:[#allocation9 + $0x3cc] ss:$16 sps:$4 sm:$0xff]   ;;  %v4715_v23 = vld [vmem:[#allocation9 + $0x1c8] ss:$16 sps:$4 sm:$0xff]  }
 0x1d3   :  { %2616 = vmatpush2.bf16.msra.mxu0 %v4637_v48  ;;  %v4718_v48 = vld [vmem:[#allocation9 + $0x3c8] ss:$16 sps:$4 sm:$0xff]  }
 0x1d4   :  { %2659 = vmatpush2.bf16.msra.mxu1 %v4640_v28  ;;  %2617 = vmatprep.subr.bf16.mxu0 %v4645_v30  ;;  %v4723_v28 = vld [vmem:[#allocation9 + $0x1ac] ss:$16 sps:$4 sm:$0xff]  }
 0x1d5   :  { %2660 = vmatprep.subr.bf16.mxu1 %v4648_v39  ;;  %v4726_v30 = vld [vmem:[#allocation9 + $0x3ac] ss:$16 sps:$4 sm:$0xff]   ;;  %v4721_v39 = vld [vmem:[#allocation9 + $0x1a8] ss:$16 sps:$4 sm:$0xff]  }
 0x1d7   :  { %2618 = vmatpush2.bf16.msra.mxu0 %v4643_v40  ;;  %v4724_v40 = vld [vmem:[#allocation9 + $0x3a8] ss:$16 sps:$4 sm:$0xff]  }
 0x1d8   :  { %2661 = vmatpush2.bf16.msra.mxu1 %v4646_v41  ;;  %2619 = vmatprep.subr.bf16.mxu0 %v4651_v43  ;;  %v4729_v41 = vld [vmem:[#allocation9 + $0x18c] ss:$16 sps:$4 sm:$0xff]  }
 0x1d9   :  { %2662 = vmatprep.subr.bf16.mxu1 %v4654_v34  ;;  %v4732_v43 = vld [vmem:[#allocation9 + $0x38c] ss:$16 sps:$4 sm:$0xff]   ;;  %v4727_v34 = vld [vmem:[#allocation9 + $0x188] ss:$16 sps:$4 sm:$0xff]  }
 0x1db   :  { %2620 = vmatpush2.bf16.msra.mxu0 %v4649_v61  ;;  %v4730_v61 = vld [vmem:[#allocation9 + $0x388] ss:$16 sps:$4 sm:$0xff]  }
 0x1dc   :  { %2663 = vmatpush2.bf16.msra.mxu1 %v4652_v54  ;;  %2621 = vmatprep.subr.bf16.mxu0 %v4657_v8  ;;  %v4735_v54 = vld [vmem:[#allocation9 + $0x16c] ss:$16 sps:$4 sm:$0xff]  }
 0x1dd   :  { %2664 = vmatprep.subr.bf16.mxu1 %v4660_v9  ;;  %v4738_v8 = vld [vmem:[#allocation9 + $0x36c] ss:$16 sps:$4 sm:$0xff]   ;;  %v4733_v9 = vld [vmem:[#allocation9 + $0x168] ss:$16 sps:$4 sm:$0xff]  }
 0x1df   :  { %2622 = vmatpush2.bf16.msra.mxu0 %v4655_v25  ;;  %v4736_v25 = vld [vmem:[#allocation9 + $0x368] ss:$16 sps:$4 sm:$0xff]  }
 0x1e0   :  { %2665 = vmatpush2.bf16.msra.mxu1 %v4658_v6  ;;  %2677 = vmatprep.subr.bf16.mxu0 %v4663_v10  ;;  %v4741_v6 = vld [vmem:[#allocation9 + $0x14c] ss:$16 sps:$4 sm:$0xff]  }
 0x1e1   :  { %2720 = vmatprep.subr.bf16.mxu1 %v4666_v7  ;;  %v4744_v10 = vld [vmem:[#allocation9 + $0x34c] ss:$16 sps:$4 sm:$0xff]   ;;  %v4739_v7 = vld [vmem:[#allocation9 + $0x148] ss:$16 sps:$4 sm:$0xff]  }
 0x1e2   :  { %2624 = vmatmul.mubr.bf16.vlgmr.msra.gmra.mxu0 %v5532_v63 }
 0x1e3   :  { %2667 = vmatmul.mubr.bf16.vlgmr.msra.gmra.mxu1 %v5534_v20  ;;  %2678 = vmatpush1.bf16.msra.mxu0 %v4661_v15  ;;  %v4742_v15 = vld [vmem:[#allocation9 + $0x348] ss:$16 sps:$4 sm:$0xff]  }
 0x1e4   :  { %2709 = vmatprep.mubr.bf16.mxu0 %v5514_v12  ;;  %2721 = vmatpush1.bf16.msra.mxu1 %v4664_v46  ;;  %v4682_v12 = vld [vmem:[#allocation9 + $0x288] ss:$16 sps:$4 sm:$0xff]   ;;  %v4747_v46 = vld [vmem:[#allocation9 + $0x12c] ss:$16 sps:$4 sm:$0xff]  }
 0x1e5   :  { %2752 = vmatprep.mubr.bf16.mxu1 %v5516_v17  ;;  %2679 = vmatprep.subr.bf16.mxu0 %v4669_v13  ;;  %v4685_v17 = vld [vmem:[#allocation9 + $0x68] ss:$16 sps:$4 sm:$0xff]   ;;  %v4750_v13 = vld [vmem:[#allocation9 + $0x32c] ss:$16 sps:$4 sm:$0xff]  }
 0x1e6   :  { %2722 = vmatprep.subr.bf16.mxu1 %v4672_v45  ;;  %v4745_v45 = vld [vmem:[#allocation9 + $0x128] ss:$16 sps:$4 sm:$0xff]  }
 0x1e7   :  { %2680 = vmatpush1.bf16.msra.mxu0 %v4667_v50  ;;  %v4748_v50 = vld [vmem:[#allocation9 + $0x328] ss:$16 sps:$4 sm:$0xff]  }
 0x1e8   :  { %2723 = vmatpush1.bf16.msra.mxu1 %v4670_v24  ;;  %2681 = vmatprep.subr.bf16.mxu0 %v4675_v59  ;;  %v4753_v24 = vld [vmem:[#allocation9 + $0x10c] ss:$16 sps:$4 sm:$0xff]  }
 0x1e9   :  { %2724 = vmatprep.subr.bf16.mxu1 %v4678_v62  ;;  %v4756_v59 = vld [vmem:[#allocation9 + $0x30c] ss:$16 sps:$4 sm:$0xff]   ;;  %v4751_v62 = vld [vmem:[#allocation9 + $0x108] ss:$16 sps:$4 sm:$0xff]  }
 0x1eb   :  { %2682 = vmatpush1.bf16.msra.mxu0 %v4673_v52  ;;  %v4754_v52 = vld [vmem:[#allocation9 + $0x308] ss:$16 sps:$4 sm:$0xff]  }
 0x1ec   :  { %2725 = vmatpush1.bf16.msra.mxu1 %v4676_v32  ;;  %2683 = vmatprep.subr.bf16.mxu0 %v4681_v53  ;;  %v4759_v32 = vld [vmem:[#allocation9 + $0x4ec] ss:$16 sps:$4 sm:$0xff]  }
 0x1ed   :  { %2726 = vmatprep.subr.bf16.mxu1 %v4684_v4  ;;  %v4762_v53 = vld [vmem:[#allocation9 + $0x6ec] ss:$16 sps:$4 sm:$0xff]   ;;  %v4757_v4 = vld [vmem:[#allocation9 + $0x4e8] ss:$16 sps:$4 sm:$0xff]  }
 0x1ef   :  { %2684 = vmatpush1.bf16.msra.mxu0 %v4679_v56  ;;  %v4760_v56 = vld [vmem:[#allocation9 + $0x6e8] ss:$16 sps:$4 sm:$0xff]  }
 0x1f0   :  { %2727 = vmatpush1.bf16.msra.mxu1 %v4682_v12  ;;  %2685 = vmatprep.subr.bf16.mxu0 %v4687_v37  ;;  %v4765_v12 = vld [vmem:[#allocation9 + $0x4cc] ss:$16 sps:$4 sm:$0xff]  }
 0x1f1   :  { %2728 = vmatprep.subr.bf16.mxu1 %v4690_v33  ;;  %v4768_v37 = vld [vmem:[#allocation9 + $0x6cc] ss:$16 sps:$4 sm:$0xff]   ;;  %v4763_v33 = vld [vmem:[#allocation9 + $0x4c8] ss:$16 sps:$4 sm:$0xff]  }
 0x1f3   :  { %2686 = vmatpush1.bf16.msra.mxu0 %v4685_v17  ;;  %v4766_v17 = vld [vmem:[#allocation9 + $0x6c8] ss:$16 sps:$4 sm:$0xff]  }
 0x1f4   :  { %2729 = vmatpush1.bf16.msra.mxu1 %v4688_v57  ;;  %2687 = vmatprep.subr.bf16.mxu0 %v4693_v58  ;;  %v4771_v57 = vld [vmem:[#allocation9 + $0x4ac] ss:$16 sps:$4 sm:$0xff]  }
 0x1f5   :  { %2730 = vmatprep.subr.bf16.mxu1 %v4696_v51  ;;  %v4774_v58 = vld [vmem:[#allocation9 + $0x6ac] ss:$16 sps:$4 sm:$0xff]   ;;  %v4769_v51 = vld [vmem:[#allocation9 + $0x4a8] ss:$16 sps:$4 sm:$0xff]  }
 0x1f7   :  { %2688 = vmatpush1.bf16.msra.mxu0 %v4691_v60  ;;  %v4777_v60 = vld [vmem:[#allocation9 + $0x48c] ss:$16 sps:$4 sm:$0xff]  }
 0x1f8   :  { %2731 = vmatpush1.bf16.msra.mxu1 %v4694_v1  ;;  %2689 = vmatprep.subr.bf16.mxu0 %v4699_v0  ;;  %v4775_v1 = vld [vmem:[#allocation9 + $0x488] ss:$16 sps:$4 sm:$0xff]   ;;  %v4783_v0 = vld [vmem:[#allocation9 + $0x46c] ss:$16 sps:$4 sm:$0xff]  }
 0x1f9   :  { %2732 = vmatprep.subr.bf16.mxu1 %v4702_v5  ;;  %v4786_v5 = vld [vmem:[#allocation9 + $0x66c] ss:$16 sps:$4 sm:$0xff]  }
 0x1fb   :  { %2690 = vmatpush1.bf16.msra.mxu0 %v4697_v26  ;;  %v4784_v26 = vld [vmem:[#allocation9 + $0x668] ss:$16 sps:$4 sm:$0xff]  }
 0x1fc   :  { %2733 = vmatpush1.bf16.msra.mxu1 %v4700_v27  ;;  %2691 = vmatprep.subr.bf16.mxu0 %v4705_v38  ;;  %v4789_v27 = vld [vmem:[#allocation9 + $0x44c] ss:$16 sps:$4 sm:$0xff]  }
 0x1fd   :  { %2734 = vmatprep.subr.bf16.mxu1 %v4708_v14  ;;  %v4792_v38 = vld [vmem:[#allocation9 + $0x64c] ss:$16 sps:$4 sm:$0xff]   ;;  %v4787_v14 = vld [vmem:[#allocation9 + $0x448] ss:$16 sps:$4 sm:$0xff]  }
 0x1ff   :  { %2692 = vmatpush1.bf16.msra.mxu0 %v4703_v18  ;;  %v4790_v18 = vld [vmem:[#allocation9 + $0x648] ss:$16 sps:$4 sm:$0xff]  }
 0x200   :  { %2735 = vmatpush1.bf16.msra.mxu1 %v4706_v16  ;;  %2693 = vmatprep.subr.bf16.mxu0 %v4711_v29  ;;  %v4795_v16 = vld [vmem:[#allocation9 + $0x42c] ss:$16 sps:$4 sm:$0xff]  }
 0x201   :  { %2736 = vmatprep.subr.bf16.mxu1 %v4714_v21  ;;  %v4798_v29 = vld [vmem:[#allocation9 + $0x62c] ss:$16 sps:$4 sm:$0xff]   ;;  %v4793_v21 = vld [vmem:[#allocation9 + $0x428] ss:$16 sps:$4 sm:$0xff]  }
 0x203   :  { %2694 = vmatpush2.bf16.msra.mxu0 %v4709_v22  ;;  %v4796_v22 = vld [vmem:[#allocation9 + $0x628] ss:$16 sps:$4 sm:$0xff]  }
 0x204   :  { %2737 = vmatpush2.bf16.msra.mxu1 %v4712_v2  ;;  %2695 = vmatprep.subr.bf16.mxu0 %v4717_v35  ;;  %v4801_v2 = vld [vmem:[#allocation9 + $0x40c] ss:$16 sps:$4 sm:$0xff]  }
 0x205   :  { %2738 = vmatprep.subr.bf16.mxu1 %v4720_v11  ;;  %v4804_v35 = vld [vmem:[#allocation9 + $0x60c] ss:$16 sps:$4 sm:$0xff]   ;;  %v4799_v11 = vld [vmem:[#allocation9 + $0x408] ss:$16 sps:$4 sm:$0xff]  }
 0x207   :  { %2696 = vmatpush2.bf16.msra.mxu0 %v4715_v23  ;;  %v4802_v23 = vld [vmem:[#allocation9 + $0x608] ss:$16 sps:$4 sm:$0xff]  }
 0x208   :  { %2739 = vmatpush2.bf16.msra.mxu1 %v4718_v48  ;;  %2697 = vmatprep.subr.bf16.mxu0 %v4723_v28  ;;  %v4807_v48 = vld [vmem:[#allocation9 + $0x5ec] ss:$16 sps:$4 sm:$0xff]  }
 0x209   :  { %2740 = vmatprep.subr.bf16.mxu1 %v4726_v30  ;;  %v4810_v28 = vld [vmem:[#allocation9 + $0x7ec] ss:$16 sps:$4 sm:$0xff]   ;;  %v4805_v30 = vld [vmem:[#allocation9 + $0x5e8] ss:$16 sps:$4 sm:$0xff]  }
 0x20b   :  { %2698 = vmatpush2.bf16.msra.mxu0 %v4721_v39  ;;  %v4808_v39 = vld [vmem:[#allocation9 + $0x7e8] ss:$16 sps:$4 sm:$0xff]  }
 0x20c   :  { %2741 = vmatpush2.bf16.msra.mxu1 %v4724_v40  ;;  %2699 = vmatprep.subr.bf16.mxu0 %v4729_v41  ;;  %v4813_v40 = vld [vmem:[#allocation9 + $0x5cc] ss:$16 sps:$4 sm:$0xff]  }
 0x20d   :  { %2742 = vmatprep.subr.bf16.mxu1 %v4732_v43  ;;  %v4816_v41 = vld [vmem:[#allocation9 + $0x7cc] ss:$16 sps:$4 sm:$0xff]   ;;  %v4811_v43 = vld [vmem:[#allocation9 + $0x5c8] ss:$16 sps:$4 sm:$0xff]  }
 0x20f   :  { %2700 = vmatpush2.bf16.msra.mxu0 %v4727_v34  ;;  %v4814_v34 = vld [vmem:[#allocation9 + $0x7c8] ss:$16 sps:$4 sm:$0xff]  }
 0x210   :  { %2743 = vmatpush2.bf16.msra.mxu1 %v4730_v61  ;;  %2701 = vmatprep.subr.bf16.mxu0 %v4735_v54  ;;  %v4819_v61 = vld [vmem:[#allocation9 + $0x5ac] ss:$16 sps:$4 sm:$0xff]  }
 0x211   :  { %2744 = vmatprep.subr.bf16.mxu1 %v4738_v8  ;;  %v4822_v54 = vld [vmem:[#allocation9 + $0x7ac] ss:$16 sps:$4 sm:$0xff]   ;;  %v4817_v8 = vld [vmem:[#allocation9 + $0x5a8] ss:$16 sps:$4 sm:$0xff]  }
 0x213   :  { %2702 = vmatpush2.bf16.msra.mxu0 %v4733_v9  ;;  %v4820_v9 = vld [vmem:[#allocation9 + $0x7a8] ss:$16 sps:$4 sm:$0xff]  }
 0x214   :  { %2745 = vmatpush2.bf16.msra.mxu1 %v4736_v25  ;;  %2703 = vmatprep.subr.bf16.mxu0 %v4741_v6  ;;  %v4825_v25 = vld [vmem:[#allocation9 + $0x58c] ss:$16 sps:$4 sm:$0xff]  }
 0x215   :  { %2746 = vmatprep.subr.bf16.mxu1 %v4744_v10  ;;  %v4828_v6 = vld [vmem:[#allocation9 + $0x78c] ss:$16 sps:$4 sm:$0xff]   ;;  %v4823_v10 = vld [vmem:[#allocation9 + $0x588] ss:$16 sps:$4 sm:$0xff]  }
 0x217   :  { %2704 = vmatpush2.bf16.msra.mxu0 %v4739_v7  ;;  %v4826_v7 = vld [vmem:[#allocation9 + $0x788] ss:$16 sps:$4 sm:$0xff]  }
 0x218   :  { %2747 = vmatpush2.bf16.msra.mxu1 %v4742_v15  ;;  %2705 = vmatprep.subr.bf16.mxu0 %v4747_v46  ;;  %v4831_v15 = vld [vmem:[#allocation9 + $0x56c] ss:$16 sps:$4 sm:$0xff]  }
 0x219   :  { %2748 = vmatprep.subr.bf16.mxu1 %v4750_v13  ;;  %v4834_v46 = vld [vmem:[#allocation9 + $0x76c] ss:$16 sps:$4 sm:$0xff]   ;;  %v4829_v13 = vld [vmem:[#allocation9 + $0x568] ss:$16 sps:$4 sm:$0xff]  }
 0x21b   :  { %2706 = vmatpush2.bf16.msra.mxu0 %v4745_v45  ;;  %v4832_v45 = vld [vmem:[#allocation9 + $0x768] ss:$16 sps:$4 sm:$0xff]  }
 0x21c   :  { %2749 = vmatpush2.bf16.msra.mxu1 %v4748_v50  ;;  %2707 = vmatprep.subr.bf16.mxu0 %v4753_v24  ;;  %v4837_v50 = vld [vmem:[#allocation9 + $0x54c] ss:$16 sps:$4 sm:$0xff]  }
 0x21d   :  { %2750 = vmatprep.subr.bf16.mxu1 %v4756_v59  ;;  %v4840_v24 = vld [vmem:[#allocation9 + $0x74c] ss:$16 sps:$4 sm:$0xff]   ;;  %v4835_v59 = vld [vmem:[#allocation9 + $0x548] ss:$16 sps:$4 sm:$0xff]  }
 0x21f   :  { %2708 = vmatpush2.bf16.msra.mxu0 %v4751_v62  ;;  %v4838_v62 = vld [vmem:[#allocation9 + $0x748] ss:$16 sps:$4 sm:$0xff]  }
 0x220   :  { %2751 = vmatpush2.bf16.msra.mxu1 %v4754_v52  ;;  %2763 = vmatprep.subr.bf16.mxu0 %v4759_v32  ;;  %v4843_v52 = vld [vmem:[#allocation9 + $0x52c] ss:$16 sps:$4 sm:$0xff]  }
 0x221   :  { %2806 = vmatprep.subr.bf16.mxu1 %v4762_v53  ;;  %v4846_v32 = vld [vmem:[#allocation9 + $0x72c] ss:$16 sps:$4 sm:$0xff]   ;;  %v4841_v53 = vld [vmem:[#allocation9 + $0x528] ss:$16 sps:$4 sm:$0xff]  }
 0x222   :  { %2710 = vmatmul.mubr.bf16.vlgmr.msra.gmra.mxu0 %v5518_v19  ;;  %v4772_v19 = vld [vmem:[#allocation9 + $0x6a8] ss:$16 sps:$4 sm:$0xff]  }
 0x223   :  { %2753 = vmatmul.mubr.bf16.vlgmr.msra.gmra.mxu1 %v5521_v31  ;;  %2764 = vmatpush1.bf16.msra.mxu0 %v4757_v4  ;;  %v4780_v31 = vld [vmem:[#allocation9 + $0x68c] ss:$16 sps:$4 sm:$0xff]   ;;  %v4844_v4 = vld [vmem:[#allocation9 + $0x728] ss:$16 sps:$4 sm:$0xff]  }
 0x224   :  { %2795 = vmatprep.mubr.bf16.mxu0 %v5526_v36  ;;  %2807 = vmatpush1.bf16.msra.mxu1 %v4760_v56  ;;  %v4778_v36 = vld [vmem:[#allocation9 + $0x688] ss:$16 sps:$4 sm:$0xff]   ;;  %v4849_v56 = vld [vmem:[#allocation9 + $0x50c] ss:$16 sps:$4 sm:$0xff]  }
 0x225   :  { %2838 = vmatprep.mubr.bf16.mxu1 %v5528_v42  ;;  %2765 = vmatprep.subr.bf16.mxu0 %v4765_v12  ;;  %v4781_v42 = vld [vmem:[#allocation9 + $0x468] ss:$16 sps:$4 sm:$0xff]   ;;  %v4852_v12 = vld [vmem:[#allocation9 + $0x70c] ss:$16 sps:$4 sm:$0xff]  }
 0x226   :  { %2808 = vmatprep.subr.bf16.mxu1 %v4768_v37  ;;  %v4847_v37 = vld [vmem:[#allocation9 + $0x508] ss:$16 sps:$4 sm:$0xff]  }
 0x227   :  { %2766 = vmatpush1.bf16.msra.mxu0 %v4763_v33  ;;  %v4850_v33 = vld [vmem:[#allocation9 + $0x708] ss:$16 sps:$4 sm:$0xff]  }
 0x228   :  { %2809 = vmatpush1.bf16.msra.mxu1 %v4766_v17  ;;  %2767 = vmatprep.subr.bf16.mxu0 %v4771_v57  ;;  %v4855_v17 = vld [vmem:[#allocation10 + $0x74] ss:$8 sps:$4 sm:$0xff]  }
 0x229   :  { %2810 = vmatprep.subr.bf16.mxu1 %v4774_v58  ;;  %v4858_v57 = vld [vmem:[#allocation10 + $0x174] ss:$8 sps:$4 sm:$0xff]   ;;  %v4853_v58 = vld [vmem:[#allocation10 + $0x70] ss:$8 sps:$4 sm:$0xff]  }
 0x22b   :  { %2768 = vmatpush1.bf16.msra.mxu0 %v4769_v51  ;;  %v4856_v51 = vld [vmem:[#allocation10 + $0x170] ss:$8 sps:$4 sm:$0xff]  }
 0x22c   :  { %2811 = vmatpush1.bf16.msra.mxu1 %v4772_v19  ;;  %2769 = vmatprep.subr.bf16.mxu0 %v4777_v60  ;;  %v4861_v19 = vld [vmem:[#allocation10 + $0x64] ss:$8 sps:$4 sm:$0xff]  }
 0x22d   :  { %2812 = vmatprep.subr.bf16.mxu1 %v4780_v31  ;;  %v4864_v60 = vld [vmem:[#allocation10 + $0x164] ss:$8 sps:$4 sm:$0xff]   ;;  %v4859_v31 = vld [vmem:[#allocation10 + $0x60] ss:$8 sps:$4 sm:$0xff]  }
 0x22f   :  { %2770 = vmatpush1.bf16.msra.mxu0 %v4775_v1  ;;  %v4862_v1 = vld [vmem:[#allocation10 + $0x160] ss:$8 sps:$4 sm:$0xff]  }
 0x230   :  { %2813 = vmatpush1.bf16.msra.mxu1 %v4778_v36  ;;  %2771 = vmatprep.subr.bf16.mxu0 %v4783_v0  ;;  %v4867_v36 = vld [vmem:[#allocation10 + $0x54] ss:$8 sps:$4 sm:$0xff]   ;;  %v4865_v0 = vld [vmem:[#allocation10 + $0x50] ss:$8 sps:$4 sm:$0xff]  }
 0x231   :  { %2814 = vmatprep.subr.bf16.mxu1 %v4786_v5  ;;  %v4873_v5 = vld [vmem:[#allocation10 + $0x44] ss:$8 sps:$4 sm:$0xff]  }
 0x233   :  { %2772 = vmatpush1.bf16.msra.mxu0 %v4781_v42  ;;  %v4876_v42 = vld [vmem:[#allocation10 + $0x144] ss:$8 sps:$4 sm:$0xff]  }
 0x234   :  { %2815 = vmatpush1.bf16.msra.mxu1 %v4784_v26  ;;  %2773 = vmatprep.subr.bf16.mxu0 %v4789_v27  ;;  %v4871_v26 = vld [vmem:[#allocation10 + $0x40] ss:$8 sps:$4 sm:$0xff]  }
 0x235   :  { %2816 = vmatprep.subr.bf16.mxu1 %v4792_v38  ;;  %v4874_v27 = vld [vmem:[#allocation10 + $0x140] ss:$8 sps:$4 sm:$0xff]   ;;  %v4879_v38 = vld [vmem:[#allocation10 + $0x34] ss:$8 sps:$4 sm:$0xff]  }
 0x237   :  { %2774 = vmatpush1.bf16.msra.mxu0 %v4787_v14  ;;  %v4882_v14 = vld [vmem:[#allocation10 + $0x134] ss:$8 sps:$4 sm:$0xff]  }
 0x238   :  { %2817 = vmatpush1.bf16.msra.mxu1 %v4790_v18  ;;  %2775 = vmatprep.subr.bf16.mxu0 %v4795_v16  ;;  %v4877_v18 = vld [vmem:[#allocation10 + $0x30] ss:$8 sps:$4 sm:$0xff]  }
 0x239   :  { %2818 = vmatprep.subr.bf16.mxu1 %v4798_v29  ;;  %v4880_v16 = vld [vmem:[#allocation10 + $0x130] ss:$8 sps:$4 sm:$0xff]   ;;  %v4885_v29 = vld [vmem:[#allocation10 + $0x24] ss:$8 sps:$4 sm:$0xff]  }
 0x23b   :  { %2776 = vmatpush1.bf16.msra.mxu0 %v4793_v21  ;;  %v4888_v21 = vld [vmem:[#allocation10 + $0x124] ss:$8 sps:$4 sm:$0xff]  }
 0x23c   :  { %2819 = vmatpush1.bf16.msra.mxu1 %v4796_v22  ;;  %2777 = vmatprep.subr.bf16.mxu0 %v4801_v2  ;;  %v4883_v22 = vld [vmem:[#allocation10 + $0x20] ss:$8 sps:$4 sm:$0xff]  }
 0x23d   :  { %2820 = vmatprep.subr.bf16.mxu1 %v4804_v35  ;;  %v4886_v2 = vld [vmem:[#allocation10 + $0x120] ss:$8 sps:$4 sm:$0xff]   ;;  %v4891_v35 = vld [vmem:[#allocation10 + $0x14] ss:$8 sps:$4 sm:$0xff]  }
 0x23f   :  { %2778 = vmatpush1.bf16.msra.mxu0 %v4799_v11  ;;  %v4894_v11 = vld [vmem:[#allocation10 + $0x114] ss:$8 sps:$4 sm:$0xff]  }
 0x240   :  { %2821 = vmatpush1.bf16.msra.mxu1 %v4802_v23  ;;  %2779 = vmatprep.subr.bf16.mxu0 %v4807_v48  ;;  %v4889_v23 = vld [vmem:[#allocation10 + $0x10] ss:$8 sps:$4 sm:$0xff]  }
 0x241   :  { %2822 = vmatprep.subr.bf16.mxu1 %v4810_v28  ;;  %v4892_v48 = vld [vmem:[#allocation10 + $0x110] ss:$8 sps:$4 sm:$0xff]   ;;  %v4897_v28 = vld [vmem:[#allocation10 + $0x4] ss:$8 sps:$4 sm:$0xff]  }
 0x243   :  { %2780 = vmatpush2.bf16.msra.mxu0 %v4805_v30  ;;  %v4900_v30 = vld [vmem:[#allocation10 + $0x104] ss:$8 sps:$4 sm:$0xff]  }
 0x244   :  { %2823 = vmatpush2.bf16.msra.mxu1 %v4808_v39  ;;  %2781 = vmatprep.subr.bf16.mxu0 %v4813_v40  ;;  %v4895_v39 = vld [vmem:[#allocation10] ss:$8 sps:$4 sm:$0xff]  }
 0x245   :  { %2824 = vmatprep.subr.bf16.mxu1 %v4816_v41  ;;  %v4898_v40 = vld [vmem:[#allocation10 + $0x100] ss:$8 sps:$4 sm:$0xff]   ;;  %v4903_v41 = vld [vmem:[#allocation10 + $0xf4] ss:$8 sps:$4 sm:$0xff]  }
 0x247   :  { %2782 = vmatpush2.bf16.msra.mxu0 %v4811_v43  ;;  %v4906_v43 = vld [vmem:[#allocation10 + $0x1f4] ss:$8 sps:$4 sm:$0xff]  }
 0x248   :  { %2825 = vmatpush2.bf16.msra.mxu1 %v4814_v34  ;;  %2783 = vmatprep.subr.bf16.mxu0 %v4819_v61  ;;  %v4901_v34 = vld [vmem:[#allocation10 + $0xf0] ss:$8 sps:$4 sm:$0xff]  }
 0x249   :  { %2826 = vmatprep.subr.bf16.mxu1 %v4822_v54  ;;  %v4904_v61 = vld [vmem:[#allocation10 + $0x1f0] ss:$8 sps:$4 sm:$0xff]   ;;  %v4909_v54 = vld [vmem:[#allocation10 + $0xe4] ss:$8 sps:$4 sm:$0xff]  }
 0x24b   :  { %2784 = vmatpush2.bf16.msra.mxu0 %v4817_v8  ;;  %v4912_v8 = vld [vmem:[#allocation10 + $0x1e4] ss:$8 sps:$4 sm:$0xff]  }
 0x24c   :  { %2827 = vmatpush2.bf16.msra.mxu1 %v4820_v9  ;;  %2785 = vmatprep.subr.bf16.mxu0 %v4825_v25  ;;  %v4907_v9 = vld [vmem:[#allocation10 + $0xe0] ss:$8 sps:$4 sm:$0xff]  }
 0x24d   :  { %2828 = vmatprep.subr.bf16.mxu1 %v4828_v6  ;;  %v4910_v25 = vld [vmem:[#allocation10 + $0x1e0] ss:$8 sps:$4 sm:$0xff]   ;;  %v4915_v6 = vld [vmem:[#allocation10 + $0xd4] ss:$8 sps:$4 sm:$0xff]  }
 0x24f   :  { %2786 = vmatpush2.bf16.msra.mxu0 %v4823_v10  ;;  %v4918_v10 = vld [vmem:[#allocation10 + $0x1d4] ss:$8 sps:$4 sm:$0xff]  }
 0x250   :  { %2829 = vmatpush2.bf16.msra.mxu1 %v4826_v7  ;;  %2787 = vmatprep.subr.bf16.mxu0 %v4831_v15  ;;  %v4913_v7 = vld [vmem:[#allocation10 + $0xd0] ss:$8 sps:$4 sm:$0xff]  }
 0x251   :  { %2830 = vmatprep.subr.bf16.mxu1 %v4834_v46  ;;  %v4916_v15 = vld [vmem:[#allocation10 + $0x1d0] ss:$8 sps:$4 sm:$0xff]   ;;  %v4919_v46 = vld [vmem:[#allocation10 + $0xc0] ss:$8 sps:$4 sm:$0xff]  }
 0x253   :  { %2788 = vmatpush2.bf16.msra.mxu0 %v4829_v13  ;;  %v4921_v13 = vld [vmem:[#allocation10 + $0xc4] ss:$8 sps:$4 sm:$0xff]  }
 0x254   :  { %2831 = vmatpush2.bf16.msra.mxu1 %v4832_v45  ;;  %2789 = vmatprep.subr.bf16.mxu0 %v4837_v50  ;;  %v4922_v45 = vld [vmem:[#allocation10 + $0x1c0] ss:$8 sps:$4 sm:$0xff]   ;;  %v4924_v50 = vld [vmem:[#allocation10 + $0x1c4] ss:$8 sps:$4 sm:$0xff]  }
 0x255   :  { %2832 = vmatprep.subr.bf16.mxu1 %v4840_v24  ;;  %v4927_v24 = vld [vmem:[#allocation10 + $0xb4] ss:$8 sps:$4 sm:$0xff]  }
 0x257   :  { %2790 = vmatpush2.bf16.msra.mxu0 %v4835_v59  ;;  %v4930_v59 = vld [vmem:[#allocation10 + $0x1b4] ss:$8 sps:$4 sm:$0xff]  }
 0x258   :  { %2833 = vmatpush2.bf16.msra.mxu1 %v4838_v62  ;;  %2791 = vmatprep.subr.bf16.mxu0 %v4843_v52  ;;  %v4925_v62 = vld [vmem:[#allocation10 + $0xb0] ss:$8 sps:$4 sm:$0xff]  }
 0x259   :  { %2834 = vmatprep.subr.bf16.mxu1 %v4846_v32  ;;  %v4928_v52 = vld [vmem:[#allocation10 + $0x1b0] ss:$8 sps:$4 sm:$0xff]   ;;  %v4933_v32 = vld [vmem:[#allocation10 + $0xa4] ss:$8 sps:$4 sm:$0xff]  }
 0x25b   :  { %2792 = vmatpush2.bf16.msra.mxu0 %v4841_v53  ;;  %v4936_v53 = vld [vmem:[#allocation10 + $0x1a4] ss:$8 sps:$4 sm:$0xff]  }
 0x25c   :  { %2835 = vmatpush2.bf16.msra.mxu1 %v4844_v4  ;;  %2793 = vmatprep.subr.bf16.mxu0 %v4849_v56  ;;  %v4931_v4 = vld [vmem:[#allocation10 + $0xa0] ss:$8 sps:$4 sm:$0xff]  }
 0x25d   :  { %2836 = vmatprep.subr.bf16.mxu1 %v4852_v12  ;;  %v4934_v56 = vld [vmem:[#allocation10 + $0x1a0] ss:$8 sps:$4 sm:$0xff]   ;;  %v4939_v12 = vld [vmem:[#allocation10 + $0x94] ss:$8 sps:$4 sm:$0xff]  }
 0x25f   :  { %2794 = vmatpush2.bf16.msra.mxu0 %v4847_v37  ;;  %v4942_v37 = vld [vmem:[#allocation10 + $0x194] ss:$8 sps:$4 sm:$0xff]  }
 0x260   :  { %2837 = vmatpush2.bf16.msra.mxu1 %v4850_v33  ;;  %3457 = vmatprep.subr.bf16.mxu0 %v4855_v17  ;;  %v4937_v17 = vld [vmem:[#allocation10 + $0x90] ss:$8 sps:$4 sm:$0xff]  }
 0x261   :  { %3500 = vmatprep.subr.bf16.mxu1 %v4858_v57  ;;  %v4940_v57 = vld [vmem:[#allocation10 + $0x190] ss:$8 sps:$4 sm:$0xff]  }
 0x262   :  { %2796 = vmatmul.mubr.bf16.vlgmr.msra.gmra.mxu0 %v5532_v63  ;;  %v4870_v63 = vld [vmem:[#allocation10 + $0x154] ss:$8 sps:$4 sm:$0xff]   ;;  %v2539_v33 = vpop.f32.mrf.mxu0 }
 0x263   :  { %2839 = vmatmul.mubr.bf16.vlgmr.msra.gmra.mxu1 %v5534_v20  ;;  %3458 = vmatpush1.bf16.msra.mxu0 %v4853_v58  ;;  %v4868_v20 = vld [vmem:[#allocation10 + $0x150] ss:$8 sps:$4 sm:$0xff]   ;;  %v4945_v58 = vld [vmem:[#allocation10 + $0x84] ss:$8 sps:$4 sm:$0xff]  }
 0x264   :  { %3501 = vmatpush1.bf16.msra.mxu1 %v4856_v51  ;;  %3459 = vmatprep.subr.bf16.mxu0 %v4861_v19  ;;  %v4948_v51 = vld [vmem:[#allocation10 + $0x184] ss:$8 sps:$4 sm:$0xff]   ;;  %v2541_v19 = vpop.f32.mrf.mxu0 }
 0x265   :  { %3502 = vmatprep.subr.bf16.mxu1 %v4864_v60  ;;  %v4943_v60 = vld [vmem:[#allocation10 + $0x80] ss:$8 sps:$4 sm:$0xff]  }
 0x267   :  { %3460 = vmatpush1.bf16.msra.mxu0 %v4859_v31  ;;  %v4946_v31 = vld [vmem:[#allocation10 + $0x180] ss:$8 sps:$4 sm:$0xff]  }
 0x268   :  { %3503 = vmatpush1.bf16.msra.mxu1 %v4862_v1  ;;  %3461 = vmatprep.subr.bf16.mxu0 %v4867_v36  ;;  %v2582_v1 = vpop.f32.mrf.mxu1  ;;  %v2543_v36 = vpop.f32.mrf.mxu0 }
 0x269   :  { %3504 = vmatprep.subr.bf16.mxu1 %v4870_v63 }
 0x26a   :  { %v2584_v63 = vpop.f32.mrf.mxu1 }
 0x26b   :  { %3462 = vmatpush1.bf16.msra.mxu0 %v4865_v0  ;;  %v2545_v0 = vpop.f32.mrf.mxu0 }
 0x26c   :  { %3505 = vmatpush1.bf16.msra.mxu1 %v4868_v20  ;;  %3463 = vmatprep.subr.bf16.mxu0 %v4873_v5  ;;  %v2586_v20 = vpop.f32.mrf.mxu1 }
 0x26d   :  { %3506 = vmatprep.subr.bf16.mxu1 %v4876_v42 }
 0x26e   :  { %v2588_v42 = vpop.f32.mrf.mxu1 }
 0x26f   :  { %3464 = vmatpush1.bf16.msra.mxu0 %v4871_v26 }
 0x270   :  { %3507 = vmatpush1.bf16.msra.mxu1 %v4874_v27  ;;  %3465 = vmatprep.subr.bf16.mxu0 %v4879_v38 }
 0x271   :  { %3508 = vmatprep.subr.bf16.mxu1 %v4882_v14 }
 0x273   :  { %3466 = vmatpush1.bf16.msra.mxu0 %v4877_v18 }
 0x274   :  { %3509 = vmatpush1.bf16.msra.mxu1 %v4880_v16  ;;  %3467 = vmatprep.subr.bf16.mxu0 %v4885_v29  ;;  %v2589_v16 = vadd.f32 %v2588_v42, %v2545_v0 }
 0x275   :  { %3510 = vmatprep.subr.bf16.mxu1 %v4888_v21  ;;  %v2585_v21 = vadd.f32 %v2584_v63, %v2541_v19 }
 0x277   :  { %3468 = vmatpush1.bf16.msra.mxu0 %v4883_v22  ;;  %v2587_v22 = vadd.f32 %v2586_v20, %v2543_v36 }
 0x278   :  { %3511 = vmatpush1.bf16.msra.mxu1 %v4886_v2  ;;  %3469 = vmatprep.subr.bf16.mxu0 %v4891_v35  ;;  %v2583_v35 = vadd.f32 %v2582_v1, %v2539_v33 }
 0x279   :  { %3512 = vmatprep.subr.bf16.mxu1 %v4894_v11 }
 0x27b   :  { %3470 = vmatpush1.bf16.msra.mxu0 %v4889_v23 }
 0x27c   :  { %3513 = vmatpush1.bf16.msra.mxu1 %v4892_v48  ;;  %3471 = vmatprep.subr.bf16.mxu0 %v4897_v28 }
 0x27d   :  { %3514 = vmatprep.subr.bf16.mxu1 %v4900_v30 }
 0x27f   :  { %3472 = vmatpush1.bf16.msra.mxu0 %v4895_v39 }
 0x280   :  { %3515 = vmatpush1.bf16.msra.mxu1 %v4898_v40  ;;  %3473 = vmatprep.subr.bf16.mxu0 %v4903_v41 }
 0x281   :  { %3516 = vmatprep.subr.bf16.mxu1 %v4906_v43 }
 0x283   :  { %3474 = vmatpush2.bf16.msra.mxu0 %v4901_v34 }
 0x284   :  { %3517 = vmatpush2.bf16.msra.mxu1 %v4904_v61  ;;  %3475 = vmatprep.subr.bf16.mxu0 %v4909_v54 }
 0x285   :  { %3518 = vmatprep.subr.bf16.mxu1 %v4912_v8 }
 0x287   :  { %3476 = vmatpush2.bf16.msra.mxu0 %v4907_v9 }
 0x288   :  { %3519 = vmatpush2.bf16.msra.mxu1 %v4910_v25  ;;  %3477 = vmatprep.subr.bf16.mxu0 %v4915_v6 }
 0x289   :  { %3520 = vmatprep.subr.bf16.mxu1 %v4918_v10 }
 0x28b   :  { %3478 = vmatpush2.bf16.msra.mxu0 %v4913_v7 }
 0x28c   :  { %3521 = vmatpush2.bf16.msra.mxu1 %v4916_v15  ;;  %3479 = vmatprep.subr.bf16.mxu0 %v4921_v13 }
 0x28d   :  { %3522 = vmatprep.subr.bf16.mxu1 %v4924_v50 }
 0x28f   :  { %3480 = vmatpush2.bf16.msra.mxu0 %v4919_v46 }
 0x290   :  { %3523 = vmatpush2.bf16.msra.mxu1 %v4922_v45  ;;  %3481 = vmatprep.subr.bf16.mxu0 %v4927_v24 }
 0x291   :  { %3524 = vmatprep.subr.bf16.mxu1 %v4930_v59 }
 0x293   :  { %3482 = vmatpush2.bf16.msra.mxu0 %v4925_v62 }
 0x294   :  { %3525 = vmatpush2.bf16.msra.mxu1 %v4928_v52  ;;  %3483 = vmatprep.subr.bf16.mxu0 %v4933_v32 }
 0x295   :  { %3526 = vmatprep.subr.bf16.mxu1 %v4936_v53 }
 0x297   :  { %3484 = vmatpush2.bf16.msra.mxu0 %v4931_v4 }
 0x298   :  { %3527 = vmatpush2.bf16.msra.mxu1 %v4934_v56  ;;  %3485 = vmatprep.subr.bf16.mxu0 %v4939_v12 }
 0x299   :  { %3528 = vmatprep.subr.bf16.mxu1 %v4942_v37 }
 0x29b   :  { %3486 = vmatpush2.bf16.msra.mxu0 %v4937_v17 }
 0x29c   :  { %3529 = vmatpush2.bf16.msra.mxu1 %v4940_v57  ;;  %3487 = vmatprep.subr.bf16.mxu0 %v4945_v58 }
 0x29d   :  { %3530 = vmatprep.subr.bf16.mxu1 %v4948_v51 }
 0x29f   :  { %3488 = vmatpush2.bf16.msra.mxu0 %v4943_v60 }
 0x2a0   :  { %3531 = vmatpush2.bf16.msra.mxu1 %v4946_v31 }
 0x2a2   :  { %v2625_v5 = vpop.f32.mrf.mxu0 }
 0x2a3   :  { %v2668_v27 = vpop.f32.mrf.mxu1  ;;  %v2626_v28 = vadd.f32 %v2625_v5, %v2583_v35 }
 0x2a4   :  { %v2627_v26 = vpop.f32.mrf.mxu0 }
 0x2a5   :  { %v2670_v14 = vpop.f32.mrf.mxu1  ;;  %v2628_v11 = vadd.f32 %v2627_v26, %v2585_v21  ;;  %v5552_v41 = vadd.f32 %v2668_v27, %v2626_v28 }
 0x2a6   :  { %v2629_v38 = vpop.f32.mrf.mxu0 }
 0x2a7   :  { %v2672_v29 = vpop.f32.mrf.mxu1  ;;  %v2630_v23 = vadd.f32 %v2629_v38, %v2587_v22  ;;  %v5548_v39 = vadd.f32 %v2670_v14, %v2628_v11  ;;  %v2879_v6 = vmul.f32 %v5552_v41, %v5552_v41 }
 0x2a8   :  { %v2631_v18 = vpop.f32.mrf.mxu0 }
 0x2a9   :  { %v2632_v2 = vadd.f32 %v2631_v18, %v2589_v16  ;;  %v2674_v48 = vpop.f32.mrf.mxu1  ;;  %v5550_v40 = vadd.f32 %v2672_v29, %v2630_v23  ;;  %v2880_v61 = vmul.f32 %v5548_v39, %v5548_v39 }
 0x2ab   :  { %v5546_v30 = vadd.f32 %v2674_v48, %v2632_v2  ;;  %v2851_v54 = vadd.f32 %v5550_v40, %v5552_v41  ;;  %v2883_v8 = vmul.f32 %v5550_v40, %v5550_v40 }
 0x2ad   :  { %v2858_v43 = vadd.f32 %v5546_v30, %v5548_v39  ;;  %v2884_v34 = vmul.f32 %v5546_v30, %v5546_v30  ;;  %v2852_v15 = vrot.slane %v2851_v54, 4  ;;  %v2887_v46 = vadd.f32 %v2883_v8, %v2879_v6 }
 0x2af   :  { %v2859_v10 = vrot.slane %v2858_v43, 4  ;;  %v2894_v7 = vadd.f32 %v2884_v34, %v2880_v61  ;;  %v2853_v59 = vadd.f32 %v2852_v15, %v2851_v54  ;;  %v2888_v62 = vrot.slane %v2887_v46, 4 }
 0x2b1   :  { %v2860_v50 = vadd.f32 %v2859_v10, %v2858_v43  ;;  %v2895_v24 = vrot.slane %v2894_v7, 4  ;;  %v2854_v56 = vrot.slane %v2853_v59, 2  ;;  %v2889_v12 = vadd.f32 %v2888_v62, %v2887_v46 }
 0x2b3   :  { %v2861_v53 = vrot.slane %v2860_v50, 2  ;;  %v2896_v4 = vadd.f32 %v2895_v24, %v2894_v7  ;;  %v2855_v1 = vadd.f32 %v2854_v56, %v2853_v59  ;;  %v2890_v36 = vrot.slane %v2889_v12, 2 }
 0x2b5   :  { %v2862_v57 = vadd.f32 %v2861_v53, %v2860_v50  ;;  %v2897_v58 = vrot.slane %v2896_v4, 2  ;;  %v2856_v29 = vrot.slane %v2855_v1, 1  ;;  %v2891_v21 = vadd.f32 %v2890_v36, %v2889_v12 }
 0x2b7   :  { %v2863_v42 = vrot.slane %v2862_v57, 1  ;;  %v2898_v26 = vadd.f32 %v2897_v58, %v2896_v4  ;;  %v2857_v8 = vadd.f32 %v2856_v29, %v2855_v1 }
 0x2b9   :  { %v2864_v23 = vadd.f32 %v2863_v42, %v2862_v57  ;;  %v2899_v48 = vrot.slane %v2898_v26, 1 }
 0x2bb   :  { %v2900_v46 = vadd.f32 %v2899_v48, %v2898_v26 }
 0x2bd   :  { %v2920_v12 = vmul.f32 0.0625, %v2900_v46 }
 0x2e2   :  { %v2711_v9 = vpop.f32.mrf.mxu0 }
 0x2e3   :  { %v2754_v25 = vpop.f32.mrf.mxu1 }
 0x2e4   :  { %v2713_v13 = vpop.f32.mrf.mxu0  ;;  %v2755_v33 = vadd.f32 %v2754_v25, %v2711_v9  ;;  %v2892_v9 = vrot.slane %v2891_v21, 1 }
 0x2e5   :  { %v2756_v45 = vpop.f32.mrf.mxu1 }
 0x2e6   :  { %v2715_v52 = vpop.f32.mrf.mxu0  ;;  %v2757_v19 = vadd.f32 %v2756_v45, %v2713_v13  ;;  %v5586_v13 = vmul.f32 0.0625, %v2864_v23  ;;  %v2893_v62 = vadd.f32 %v2892_v9, %v2891_v21 }
 0x2e7   :  { %v2758_v32 = vpop.f32.mrf.mxu1 }
 0x2e8   :  { %v2717_v37 = vpop.f32.mrf.mxu0  ;;  %v2759_v0 = vadd.f32 %v2758_v32, %v2715_v52  ;;  %v2915_v52 = vmul.f32 0.0625, %v2857_v8 }
 0x2e9   :  { %v2760_v17 = vpop.f32.mrf.mxu1 }
 0x2ea   :  { %v2761_v38 = vadd.f32 %v2760_v17, %v2717_v37  ;;  %v2924_v37 = vmul.f32 %v5586_v13, %v5586_v13 }
 0x322   :  { %v2797_v51 = vpop.f32.mrf.mxu0 }
 0x323   :  { %v2798_v60 = vadd.f32 %v2797_v51, %v2755_v33  ;;  %v2840_v31 = vpop.f32.mrf.mxu1  ;;  %v2919_v51 = vmul.f32 0.0625, %v2893_v62 }
 0x324   :  { %v2799_v63 = vpop.f32.mrf.mxu0 }
 0x325   :  { %v2800_v20 = vadd.f32 %v2799_v63, %v2757_v19  ;;  %v2842_v5 = vpop.f32.mrf.mxu1  ;;  %v5566_v14 = vadd.f32 %v2840_v31, %v2798_v60  ;;  %v2923_v19 = vmul.f32 %v2915_v52, %v2915_v52  ;;  %v2928_v63 = vsub.f32 %v2920_v12, %v2924_v37 }
 0x326   :  { %v2801_v27 = vpop.f32.mrf.mxu0 }
 0x327   :  { %v2802_v18 = vadd.f32 %v2801_v27, %v2759_v0  ;;  %v2844_v16 = vpop.f32.mrf.mxu1  ;;  %v5568_v22 = vadd.f32 %v2842_v5, %v2800_v20  ;;  %v2881_v43 = vmul.f32 %v5566_v14, %v5566_v14  ;;  %v2927_v26 = vsub.f32 %v2919_v51, %v2923_v19 }
 0x328   :  { %v2803_v2 = vpop.f32.mrf.mxu0  ;;  %v2932_v29 = vadd.f32 1e-05, %v2928_v63 }
 0x329   :  { %v5570_v35 = vadd.f32 %v2844_v16, %v2802_v18  ;;  %v2804_v11 = vadd.f32 %v2803_v2, %v2761_v38  ;;  %v2846_v28 = vpop.f32.mrf.mxu1  ;;  %v2882_v25 = vmul.f32 %v5568_v22, %v5568_v22  ;;  %v2931_v48 = vadd.f32 1e-05, %v2927_v26 }
 0x32a   :  { %4989 = vrsqrt.f32 %v2932_v29 }
 0x32b   :  { %v2865_v34 = vadd.f32 %v5570_v35, %v5566_v14  ;;  %v2885_v61 = vmul.f32 %v5570_v35, %v5570_v35  ;;  %v5578_v54 = vadd.f32 %v2846_v28, %v2804_v11  ;;  %4991 = vrsqrt.f32 %v2931_v48 }
 0x32d   :  { %v2866_v6 = vrot.slane %v2865_v34, 4  ;;  %v2901_v10 = vadd.f32 %v2885_v61, %v2881_v43  ;;  %v2872_v7 = vadd.f32 %v5578_v54, %v5568_v22  ;;  %v2886_v15 = vmul.f32 %v5578_v54, %v5578_v54 }
 0x32f   :  { %v2867_v45 = vadd.f32 %v2866_v6, %v2865_v34  ;;  %v2902_v50 = vrot.slane %v2901_v10, 4  ;;  %v2873_v24 = vrot.slane %v2872_v7, 4  ;;  %v2908_v59 = vadd.f32 %v2886_v15, %v2882_v25 }
 0x331   :  { %v2868_v32 = vrot.slane %v2867_v45, 2  ;;  %v2903_v53 = vadd.f32 %v2902_v50, %v2901_v10  ;;  %v2874_v4 = vadd.f32 %v2873_v24, %v2872_v7  ;;  %v2909_v56 = vrot.slane %v2908_v59, 4 }
 0x333   :  { %v2869_v33 = vadd.f32 %v2868_v32, %v2867_v45  ;;  %v2904_v17 = vrot.slane %v2903_v53, 2  ;;  %v2875_v57 = vrot.slane %v2874_v4, 2  ;;  %v2910_v58 = vadd.f32 %v2909_v56, %v2908_v59  ;;  %v2849_v59 = vld [vmem:[%s5673_s5] sm:$0xf] }
 0x335   :  { %v2870_v60 = vrot.slane %v2869_v33, 1  ;;  %v2905_v31 = vadd.f32 %v2904_v17, %v2903_v53  ;;  %v2876_v1 = vadd.f32 %v2875_v57, %v2874_v4  ;;  %v2911_v36 = vrot.slane %v2910_v58, 2 }
 0x337   :  { %v2871_v0 = vadd.f32 %v2870_v60, %v2869_v33  ;;  %v2906_v20 = vrot.slane %v2905_v31, 1  ;;  %v2877_v5 = vrot.slane %v2876_v1, 1  ;;  %v2912_v42 = vadd.f32 %v2911_v36, %v2910_v58  ;;  %v4990_v25 = vpop.eup %4989 }
 0x338   :  { %v4992_v6 = vpop.eup %4991 }
 0x339   :  { %v2907_v27 = vadd.f32 %v2906_v20, %v2905_v31  ;;  %v2917_v38 = vmul.f32 0.0625, %v2871_v0  ;;  %v2878_v18 = vadd.f32 %v2877_v5, %v2876_v1  ;;  %v2913_v16 = vrot.slane %v2912_v42, 1  ;;  %v2850_v1 = vld [vmem:[%s5674_s6] sm:$0xf] }
 0x33a   :  { %v2943_v7 = vcombine.low %v4992_v6, %v4990_v25  ;;  %v4950_v25 = vld [vmem:[#allocation12 + $0x38] sm:$0xff]   ;;  %v4951_v6 = vld [vmem:[#allocation12 + $0x70] sm:$0xff]  }
 0x33b   :  { %v2921_v21 = vmul.f32 0.0625, %v2907_v27  ;;  %v2925_v2 = vmul.f32 %v2917_v38, %v2917_v38  ;;  %v2914_v11 = vadd.f32 %v2913_v16, %v2912_v42  ;;  %v2918_v23 = vmul.f32 0.0625, %v2878_v18 }
 0x33c   :  { %v2951_v45 = vrot.slane %v2943_v7, %v5452_v3  ;;  %v4953_v7 = vld [vmem:[#allocation12 + $0x68] sm:$0xff]  }
 0x33d   :  { %v2929_v28 = vsub.f32 %v2921_v21, %v2925_v2  ;;  %v2922_v43 = vmul.f32 0.0625, %v2914_v11  ;;  %v2926_v34 = vmul.f32 %v2918_v23, %v2918_v23 }
 0x33f   :  { %v2933_v61 = vadd.f32 1e-05, %v2929_v28  ;;  %v2930_v8 = vsub.f32 %v2922_v43, %v2926_v34 }
 0x341   :  { %v2934_v9 = vadd.f32 1e-05, %v2930_v8  ;;  %4993 = vrsqrt.f32 %v2933_v61 }
 0x343   :  { %4995 = vrsqrt.f32 %v2934_v9  ;;  %v4949_v9 = vld [vmem:[#allocation12 + $0x78] sm:$0xff]  }
 0x344   :  { %4398 = vmatprep.subr.bf16.mxu0 %v4949_v9 }
 0x34e   :  { %v4994_v10 = vpop.eup %4993 }
 0x350   :  { %v4996_v15 = vpop.eup %4995 }
 0x351   :  { %v2944_v46 = vcombine.low %v4994_v10, %v4996_v15  ;;  %v4952_v10 = vld [vmem:[#allocation12 + $0x30] sm:$0xff]   ;;  %v4954_v15 = vld [vmem:[#allocation12 + $0x28] sm:$0xff]  }
 0x353   :  { %v2958_v50 = vrot.slane %v2944_v46, %v5452_v3  ;;  %v4955_v46 = vld [vmem:[#allocation12 + $0x60] sm:$0xff]  }
 0x355   :  { %v2959_v24 = vcombine.low %v2951_v45, %v2958_v50  ;;  %v4956_v45 = vld [vmem:[#allocation12 + $0x20] sm:$0xff]   ;;  %v4957_v50 = vld [vmem:[#allocation12 + $0x58] sm:$0xff]  }
 0x357   :  { %v2966_v62 = vrot.slane %v2959_v24, %v5452_v3  ;;  %v4958_v24 = vld [vmem:[#allocation12 + $0x18] sm:$0xff]  }
 0x359   :  { %v2968_v32 = vmul.f32 %v2966_v62, %v2849_v59  ;;  %v4959_v59 = vld [vmem:[#allocation12 + $0x50] sm:$0xff]  }
 0x35a   :  { %v4960_v62 = vld [vmem:[#allocation12 + $0x10] sm:$0xff]  }
 0x35b   :  { %v2973_v53 = vrot.slane %v2968_v32, %v5461_v55  ;;  %v2981_v4 = vrot.slane %v2968_v32, %v5467_v47  ;;  %v2985_v56 = vrot.slane %v2968_v32, %v5470_v49  ;;  %v2977_v12 = vrot.slane %v2968_v32, %v5464_v44  ;;  %v4961_v32 = vld [vmem:[#allocation12 + $0x48] sm:$0xff]  }
 0x35d   :  { %v2992_v37 = vmul.f32 %v2981_v4, %v2917_v38  ;;  %v2993_v33 = vmul.f32 %v2985_v56, %v2918_v23  ;;  %v2990_v17 = vmul.f32 %v2973_v53, %v2915_v52  ;;  %v2991_v57 = vmul.f32 %v2977_v12, %v5586_v13 }
 0x35e   :  { %v3031_v0 = vmul.f32 %v2985_v56, %v5578_v54  ;;  %v3025_v52 = vmul.f32 %v2977_v12, %v5548_v39  ;;  %v3029_v13 = vmul.f32 %v2977_v12, %v5546_v30  ;;  %v3027_v20 = vmul.f32 %v2985_v56, %v5568_v22  ;;  %v4964_v56 = vld [vmem:[#allocation12] sm:$0xff]  }
 0x35f   :  { %v2999_v58 = vcombine.low %v2992_v37, %v2993_v33  ;;  %v2998_v51 = vcombine.low %v2990_v17, %v2991_v57  ;;  %v3024_v38 = vmul.f32 %v2973_v53, %v5552_v41  ;;  %v3028_v18 = vmul.f32 %v2973_v53, %v5550_v40  ;;  %v4962_v53 = vld [vmem:[#allocation12 + $0x8] sm:$0xff]  }
 0x360   :  { %v3026_v54 = vmul.f32 %v2981_v4, %v5566_v14  ;;  %v3030_v39 = vmul.f32 %v2981_v4, %v5570_v35  ;;  %v4963_v4 = vld [vmem:[#allocation12 + $0x40] sm:$0xff]  }
 0x361   :  { %v3013_v19 = vrot.slane %v2999_v58, %v5452_v3  ;;  %v3006_v60 = vrot.slane %v2998_v51, %v5452_v3 }
 0x363   :  { %v3014_v31 = vcombine.low %v3006_v60, %v3013_v19 }
 0x365   :  { %v3021_v36 = vrot.slane %v3014_v31, %v5452_v3 }
 0x367   :  { %v3023_v63 = vsub.f32 %v2850_v1, %v3021_v36 }
 0x369   :  { %v3040_v5 = vrot.slane %v3023_v63, %v5464_v44  ;;  %v3048_v42 = vrot.slane %v3023_v63, %v5470_v49  ;;  %v3036_v26 = vrot.slane %v3023_v63, %v5461_v55  ;;  %v3044_v27 = vrot.slane %v3023_v63, %v5467_v47 }
 0x36b   :  { %v3054_v16 = vadd.f32 %v3040_v5, %v3025_v52  ;;  %v3058_v30 = vadd.f32 %v3040_v5, %v3029_v13  ;;  %v3056_v29 = vadd.f32 %v3048_v42, %v3027_v20  ;;  %v3060_v22 = vadd.f32 %v3048_v42, %v3031_v0 }
 0x36c   :  { %v3053_v21 = vadd.f32 %v3036_v26, %v3024_v38  ;;  %v3057_v2 = vadd.f32 %v3036_v26, %v3028_v18  ;;  %v3055_v11 = vadd.f32 %v3044_v27, %v3026_v54  ;;  %v3059_v49 = vadd.f32 %v3044_v27, %v3030_v39 }
 0x36d   :  { %v3062_v23 = vmax.f32 %v3054_v16, 0.0  ;;  %v3066_v48 = vmax.f32 %v3058_v30, 0.0  ;;  %v3064_v28 = vmax.f32 %v3056_v29, 0.0  ;;  %v3068_v47 = vmax.f32 %v3060_v22, 0.0 }
 0x36e   :  { %v3061_v43 = vmax.f32 %v3053_v21, 0.0  ;;  %v3065_v41 = vmax.f32 %v3057_v2, 0.0  ;;  %v3063_v34 = vmax.f32 %v3055_v11, 0.0  ;;  %v3067_v40 = vmax.f32 %v3059_v49, 0.0 }
 0x36f   :  { %v3070_v61 = vpack.c.bf16 %v3066_v48, %v3062_v23  ;;  %v3072_v14 = vpack.c.bf16 %v3068_v47, %v3064_v28 }
 0x370   :  { %v3069_v8 = vpack.c.bf16 %v3065_v41, %v3061_v43  ;;  %v3071_v35 = vpack.c.bf16 %v3067_v40, %v3063_v34 }
 0x371   :  { %3489 = vmatprep.mubr.bf16.mxu0 %v3070_v61  ;;  %3532 = vmatprep.mubr.bf16.mxu1 %v3072_v14 }
 0x372   :  { %3490 = vmatmul.mubr.bf16.vlgmr.msra.gmra.mxu0 %v3069_v8  ;;  %3533 = vmatmul.mubr.bf16.vlgmr.msra.gmra.mxu1 %v3071_v35 }
 0x373   :  { %4399 = vmatpush3.bf16.msra.mxu0 %v4950_v25 }
 0x374   :  { %4400 = vmatprep.subr.bf16.mxu0 %v4951_v6 }
 0x377   :  { %4401 = vmatpush3.bf16.msra.mxu0 %v4952_v10 }
 0x378   :  { %4402 = vmatprep.subr.bf16.mxu0 %v4953_v7 }
 0x37b   :  { %4403 = vmatpush3.bf16.msra.mxu0 %v4954_v15 }
 0x37c   :  { %4404 = vmatprep.subr.bf16.mxu0 %v4955_v46 }
 0x37f   :  { %4405 = vmatpush3.bf16.msra.mxu0 %v4956_v45 }
 0x380   :  { %4406 = vmatprep.subr.bf16.mxu0 %v4957_v50 }
 0x383   :  { %4407 = vmatpush3.bf16.msra.mxu0 %v4958_v24 }
 0x384   :  { %4408 = vmatprep.subr.bf16.mxu0 %v4959_v59 }
 0x387   :  { %4409 = vmatpush3.bf16.msra.mxu0 %v4960_v62 }
 0x388   :  { %4410 = vmatprep.subr.bf16.mxu0 %v4961_v32 }
 0x38b   :  { %4411 = vmatpush3.bf16.msra.mxu0 %v4962_v53  ;;  %v3543_v53 = vld [vmem:[%s5676_s8] sm:$0x3] }
 0x38c   :  { %4412 = vmatprep.subr.bf16.mxu0 %v4963_v4 }
 0x38f   :  { %4413 = vmatpush3.bf16.msra.mxu0 %v4964_v56 }
 0x432   :  { %v3491_v12 = vpop.f32.mrf.mxu0  ;;  %v3534_v37 = vpop.f32.mrf.mxu1 }
 0x433   :  { %v5619_v57 = vadd.f32 %v3534_v37, %v3491_v12 }
 0x434   :  { %v3493_v33 = vpop.f32.mrf.mxu0  ;;  %v3536_v17 = vpop.f32.mrf.mxu1 }
 0x435   :  { %v5621_v58 = vadd.f32 %v3536_v17, %v3493_v33  ;;  %v3559_v36 = vmul.f32 %v5619_v57, %v5619_v57 }
 0x436   :  { %v3495_v51 = vpop.f32.mrf.mxu0  ;;  %v3538_v19 = vpop.f32.mrf.mxu1 }
 0x437   :  { %v5623_v60 = vadd.f32 %v3538_v19, %v3495_v51  ;;  %v3560_v13 = vmul.f32 %v5621_v58, %v5621_v58 }
 0x438   :  { %v3497_v31 = vpop.f32.mrf.mxu0  ;;  %v3540_v1 = vpop.f32.mrf.mxu1 }
 0x439   :  { %v3545_v63 = vadd.f32 %v5623_v60, %v5619_v57  ;;  %v3561_v0 = vmul.f32 %v5623_v60, %v5623_v60  ;;  %v3541_v52 = vadd.f32 %v3540_v1, %v3497_v31  ;;  %v3544_v31 = vld [vmem:[%s5677_s9] sm:$0x3] }
 0x43b   :  { %v3546_v20 = vrot.slane %v3545_v63, 4  ;;  %v3563_v5 = vadd.f32 %v3561_v0, %v3559_v36  ;;  %v3552_v42 = vadd.f32 %v3541_v52, %v5621_v58  ;;  %v3562_v26 = vmul.f32 %v3541_v52, %v3541_v52 }
 0x43d   :  { %v3547_v27 = vadd.f32 %v3546_v20, %v3545_v63  ;;  %v3564_v38 = vrot.slane %v3563_v5, 4  ;;  %v3553_v18 = vrot.slane %v3552_v42, 4  ;;  %v3570_v54 = vadd.f32 %v3562_v26, %v3560_v13 }
 0x43f   :  { %v3548_v39 = vrot.slane %v3547_v27, 2  ;;  %v3565_v16 = vadd.f32 %v3564_v38, %v3563_v5  ;;  %v3554_v30 = vadd.f32 %v3553_v18, %v3552_v42  ;;  %v3571_v29 = vrot.slane %v3570_v54, 4 }
 0x441   :  { %v3549_v22 = vadd.f32 %v3548_v39, %v3547_v27  ;;  %v3566_v21 = vrot.slane %v3565_v16, 2  ;;  %v3555_v2 = vrot.slane %v3554_v30, 2  ;;  %v3572_v11 = vadd.f32 %v3571_v29, %v3570_v54  ;;  %v4968_v29 = vld [vmem:[#allocation13 + $0x20] sm:$0xff]  }
 0x443   :  { %v3550_v49 = vrot.slane %v3549_v22, 1  ;;  %v3567_v23 = vadd.f32 %v3566_v21, %v3565_v16  ;;  %v3556_v48 = vadd.f32 %v3555_v2, %v3554_v30  ;;  %v3573_v28 = vrot.slane %v3572_v11, 2  ;;  %v4970_v21 = vld [vmem:[#allocation13 + $0x10] sm:$0xff]   ;;  %v4971_v2 = vld [vmem:[#allocation13 + $0x8] sm:$0xff]  }
 0x445   :  { %v3551_v47 = vadd.f32 %v3550_v49, %v3549_v22  ;;  %v3568_v43 = vrot.slane %v3567_v23, 1  ;;  %v3557_v41 = vrot.slane %v3556_v48, 1  ;;  %v3574_v34 = vadd.f32 %v3573_v28, %v3572_v11  ;;  %v4969_v22 = vld [vmem:[#allocation13 + $0x18] sm:$0xff]   ;;  %v4972_v11 = vld [vmem:[#allocation13] sm:$0xff]  }
 0x447   :  { %v3569_v40 = vadd.f32 %v3568_v43, %v3567_v23  ;;  %v3577_v61 = vmul.f32 0.0625, %v3551_v47  ;;  %v3558_v14 = vadd.f32 %v3557_v41, %v3556_v48  ;;  %v3575_v8 = vrot.slane %v3574_v34, 1 }
 0x449   :  { %v3579_v35 = vmul.f32 0.0625, %v3569_v40  ;;  %v3581_v9 = vmul.f32 %v3577_v61, %v3577_v61  ;;  %v3576_v25 = vadd.f32 %v3575_v8, %v3574_v34  ;;  %v3578_v6 = vmul.f32 0.0625, %v3558_v14 }
 0x44b   :  { %v3583_v10 = vsub.f32 %v3579_v35, %v3581_v9  ;;  %v3580_v7 = vmul.f32 0.0625, %v3576_v25  ;;  %v3582_v15 = vmul.f32 %v3578_v6, %v3578_v6 }
 0x44d   :  { %v3585_v46 = vadd.f32 1e-05, %v3583_v10  ;;  %v3584_v45 = vsub.f32 %v3580_v7, %v3582_v15 }
 0x44f   :  { %v3586_v50 = vadd.f32 1e-05, %v3584_v45  ;;  %4997 = vrsqrt.f32 %v3585_v46 }
 0x451   :  { %4999 = vrsqrt.f32 %v3586_v50 }
 0x45c   :  { %v4998_v24 = vpop.eup %4997 }
 0x45e   :  { %v5000_v59 = vpop.eup %4999 }
 0x45f   :  { %v3591_v62 = vcombine.low %v4998_v24, %v5000_v59 }
 0x461   :  { %v3598_v32 = vrot.slane %v3591_v62, %v5452_v3 }
 0x463   :  { %v3605_v4 = vrot.slane %v3598_v32, %v5452_v3 }
 0x465   :  { %v3607_v56 = vmul.f32 %v3605_v4, %v3543_v53  ;;  %v3834_v4 = vld [vmem:[%s5679_s11] sm:$0x1] }
 0x467   :  { %v3612_v12 = vrot.slane %v3607_v56, %v5461_v55  ;;  %v3616_v37 = vrot.slane %v3607_v56, %v5464_v44 }
 0x469   :  { %v3619_v33 = vmul.f32 %v3612_v12, %v3577_v61  ;;  %v3620_v17 = vmul.f32 %v3616_v37, %v3578_v6  ;;  %v3643_v63 = vmul.f32 %v3616_v37, %v3541_v52  ;;  %v3641_v0 = vmul.f32 %v3616_v37, %v5621_v58  ;;  %v4965_v58 = vld [vmem:[#allocation13 + $0x38] sm:$0xff]   ;;  %v3835_v37 = vld [vmem:[%s5680_s12] sm:$0x1] }
 0x46a   :  { %v3640_v20 = vmul.f32 %v3612_v12, %v5619_v57  ;;  %v3642_v5 = vmul.f32 %v3612_v12, %v5623_v60  ;;  %v4966_v57 = vld [vmem:[#allocation13 + $0x30] sm:$0xff]   ;;  %v4967_v60 = vld [vmem:[#allocation13 + $0x28] sm:$0xff]  }
 0x46b   :  { %v3623_v51 = vcombine.low %v3619_v33, %v3620_v17 }
 0x46d   :  { %v3630_v19 = vrot.slane %v3623_v51, %v5452_v3 }
 0x46f   :  { %v3637_v1 = vrot.slane %v3630_v19, %v5452_v3 }
 0x471   :  { %v3639_v36 = vsub.f32 %v3544_v31, %v3637_v1 }
 0x473   :  { %v3652_v13 = vrot.slane %v3639_v36, %v5464_v44  ;;  %v3648_v42 = vrot.slane %v3639_v36, %v5461_v55  ;;  %v5199_v44 = vmov 0.0  }
 0x474   :  { %4429 = vmatprep.subr.bf16.mxu1 %v5199_v44  ;;  %4445 = vmatprep.mubr.msk.bf16.mxu1 %vm5200_vm1, %v5199_v44 }
 0x475   :  { %v3656_v26 = vadd.f32 %v3652_v13, %v3641_v0  ;;  %v3658_v27 = vadd.f32 %v3652_v13, %v3643_v63  ;;  %v3655_v38 = vadd.f32 %v3648_v42, %v3640_v20  ;;  %v3657_v18 = vadd.f32 %v3648_v42, %v3642_v5  ;;  %4430 = vmatpush3.bf16.msra.mxu1 %v4965_v58  ;;  %v4387_v5 = vld [vmem:[%s5682_s14] ss:$0 sm:$0xff] }
 0x476   :  { %4431 = vmatprep.subr.bf16.mxu1 %v5199_v44 }
 0x477   :  { %v3660_v54 = vmax.f32 %v3656_v26, 0.0  ;;  %v3662_v39 = vmax.f32 %v3658_v27, 0.0  ;;  %v3659_v16 = vmax.f32 %v3655_v38, 0.0  ;;  %v3661_v3 = vmax.f32 %v3657_v18, 0.0 }
 0x479   :  { %v3664_v30 = vpack.c.bf16 %v3662_v39, %v3660_v54  ;;  %v3663_v52 = vpack.c.bf16 %v3661_v3, %v3659_v16  ;;  %4432 = vmatpush3.bf16.msra.mxu1 %v4966_v57 }
 0x47a   :  { %4433 = vmatprep.subr.bf16.mxu1 %v5199_v44 }
 0x47b   :  { %3825 = vmatprep.mubr.bf16.mxu0 %v3664_v30 }
 0x47c   :  { %3826 = vmatmul.mubr.bf16.vlgmr.msra.gmra.mxu0 %v3663_v52 }
 0x47d   :  { %4434 = vmatpush3.bf16.msra.mxu1 %v4967_v60 }
 0x47e   :  { %4435 = vmatprep.subr.bf16.mxu1 %v5199_v44 }
 0x481   :  { %4436 = vmatpush3.bf16.msra.mxu1 %v4968_v29 }
 0x482   :  { %4437 = vmatprep.subr.bf16.mxu1 %v5199_v44 }
 0x485   :  { %4438 = vmatpush3.bf16.msra.mxu1 %v4969_v22 }
 0x486   :  { %4439 = vmatprep.subr.bf16.mxu1 %v5199_v44 }
 0x489   :  { %4440 = vmatpush3.bf16.msra.mxu1 %v4970_v21 }
 0x48a   :  { %4441 = vmatprep.subr.bf16.mxu1 %v5199_v44 }
 0x48d   :  { %4442 = vmatpush3.bf16.msra.mxu1 %v4971_v2 }
 0x48e   :  { %4443 = vmatprep.subr.bf16.mxu1 %v5199_v44 }
 0x491   :  { %4444 = vmatpush3.bf16.msra.mxu1 %v4972_v11 }
 0x53c   :  { %v4414_v49 = vpop.f32.mrf.mxu0 }
 0x53e   :  { %v4415_v23 = vpop.f32.mrf.mxu0 }
 0x53f   :  { %v4416_v28 = vadd.f32 %v4415_v23, %v4414_v49 }
 0x540   :  { %v4417_v48 = vpop.f32.mrf.mxu0 }
 0x541   :  { %v3843_v41 = vmul.f32 %v4416_v28, %v4416_v28 }
 0x542   :  { %v4418_v47 = vpop.f32.mrf.mxu0 }
 0x543   :  { %v4419_v43 = vadd.f32 %v4418_v47, %v4417_v48 }
 0x545   :  { %v3836_v34 = vadd.f32 %v4419_v43, %v4416_v28  ;;  %v3844_v40 = vmul.f32 %v4419_v43, %v4419_v43 }
 0x547   :  { %v3837_v61 = vrot.slane %v3836_v34, 4  ;;  %v3845_v14 = vadd.f32 %v3844_v40, %v3843_v41 }
 0x549   :  { %v3838_v8 = vadd.f32 %v3837_v61, %v3836_v34  ;;  %v3846_v35 = vrot.slane %v3845_v14, 4 }
 0x54b   :  { %v3839_v9 = vrot.slane %v3838_v8, 2  ;;  %v3847_v25 = vadd.f32 %v3846_v35, %v3845_v14 }
 0x54d   :  { %v3840_v6 = vadd.f32 %v3839_v9, %v3838_v8  ;;  %v3848_v10 = vrot.slane %v3847_v25, 2 }
 0x54f   :  { %v3841_v7 = vrot.slane %v3840_v6, 1  ;;  %v3849_v15 = vadd.f32 %v3848_v10, %v3847_v25 }
 0x551   :  { %v3842_v46 = vadd.f32 %v3841_v7, %v3840_v6  ;;  %v3850_v45 = vrot.slane %v3849_v15, 1 }
 0x553   :  { %v3851_v50 = vadd.f32 %v3850_v45, %v3849_v15  ;;  %v3852_v24 = vmul.f32 0.0625, %v3842_v46 }
 0x555   :  { %v3853_v59 = vmul.f32 0.0625, %v3851_v50  ;;  %v3854_v62 = vmul.f32 %v3852_v24, %v3852_v24 }
 0x557   :  { %v3855_v32 = vsub.f32 %v3853_v59, %v3854_v62 }
 0x559   :  { %v3856_v53 = vadd.f32 1e-05, %v3855_v32 }
 0x55b   :  { %5001 = vrsqrt.f32 %v3856_v53 }
 0x568   :  { %v5002_v56 = vpop.eup %5001 }
 0x569   :  { %v3858_v12 = vmul.f32 %v5002_v56, %v3834_v4 }
 0x56b   :  { %v3859_v33 = vmul.f32 %v3858_v12, %v3852_v24  ;;  %v3865_v17 = vrot.slane %v3858_v12, %v5461_v55 }
 0x56d   :  { %v3860_v51 = vsub.f32 %v3835_v37, %v3859_v33  ;;  %v3867_v19 = vmul.f32 %v4416_v28, %v3865_v17  ;;  %v3868_v31 = vmul.f32 %v4419_v43, %v3865_v17 }
 0x56f   :  { %v3873_v1 = vrot.slane %v3860_v51, %v5461_v55 }
 0x571   :  { %v3876_v36 = vadd.f32 %v3873_v1, %v3868_v31  ;;  %v3875_v63 = vadd.f32 %v3873_v1, %v3867_v19 }
 0x573   :  { %v3878_v0 = vmax.f32 %v3876_v36, 0.0  ;;  %v3877_v13 = vmax.f32 %v3875_v63, 0.0 }
 0x575   :  { %v3879_v20 = vpack.c.bf16 %v3878_v0, %v3877_v13 }
 0x577   :  { %4446 = vmatmul.mubr.bf16.vlgmr.msra.gmra.mxu1 %v3879_v20 }
 0x637   :  { %v3985_v42 = vpop.f32.mrf.mxu1 }
 0x638   :  { %v3986_v26 = vadd.f32 %v4387_v5, %v3985_v42 }
 0x639   :  { %v4447_v27 = vpop.f32.mrf.mxu1 }
 0x63a   :  { %v4396_v38 = vmul.f32 -1.442695, %v3986_v26 }
 0x63b   :  { %v3988_v18 = vpop.f32.mrf.mxu1 }
 0x63c   :  { %5003 = vpow2.f32 %v4396_v38  ;;  %v3989_v54 = vadd.f32 %v4387_v5, %v3988_v18 }
 0x63d   :  { %v4448_v39 = vpop.f32.mrf.mxu1 }
 0x63e   :  { %v4397_v16 = vmul.f32 -1.442695, %v3989_v54 }
 0x640   :  { %5005 = vpow2.f32 %v4397_v16 }
 0x649   :  { %v5004_v55 = vpop.eup %5003 }
 0x64a   :  { %v3998_v3 = vadd.f32 1.0, %v5004_v55 }
 0x64c   :  { %5007 = vrcp.f32 %v3998_v3 }
 0x64d   :  { %v5006_v30 = vpop.eup %5005 }
 0x64e   :  { %v3999_v52 = vadd.f32 1.0, %v5006_v30 }
 0x650   :  { %5009 = vrcp.f32 %v3999_v52 }
 0x659   :  { %v5008_v58 = vpop.eup %5007 }
 0x65a   :  { %4004 = vst [vmem:[%s5683_s15] sm:$0xff] %v5008_v58 }
 0x65d   :  { %v5010_v44 = vpop.eup %5009 }
 0x65e   :  { %4005 = vst [vmem:[%s5683_s15 + $0x8] sm:$0xff] %v5010_v44 }
 0x65f   :  { %4010 = vsyncpa [#allocation3], 1 }
 0x660   :  { %4011 = vsyncpa [#allocation5], 1 }
 0x661   :  { %4012 = vsyncpa [#allocation8], 1 }
 0x662   :  { %4013 = vsyncpa [#allocation11], 1 }
 0x663   :  { %4014 = vsyncpa [#allocation14], 1 }

</bundles_post_ra>
